<compile_context>
chip_gen: v7x
topology: tpu7x:2x2x1
jax: 0.10.0
libtpu: 0.0.40
codegen_flags: <defaults>
</compile_context>

<pallas_src>
import functools

import jax
import jax.numpy as jnp
from jax import lax
from jax.experimental import pallas as pl
from jax.experimental.pallas import tpu as pltpu

EPS = 1e-5


# ------------------------------ Pallas kernel ------------------------------- #

def _double_conv_kernel(x_ref, w1_ref, w2_ref, bn_ref, o_ref, *, h, w):
    # x_ref : (N, Cin, H*W)    input activations, lane-dense per image
    # w1_ref: (9, Cout, Cin)   conv1 weights, tap-major: t = (dy+1)*3 + (dx+1)
    # w2_ref: (9, Cout, Cout)  conv2 weights, tap-major
    # bn_ref: (4, Cout, 1)     rows: gamma1, beta1, gamma2, beta2
    # o_ref : (N, Cout, H*W)
    n = x_ref.shape[0]
    hw = h * w

    # ---- 3x3 zero-padding boundary masks, shared by both convs -------------
    lane = lax.broadcasted_iota(jnp.int32, (1, hw), 1)
    if (w & (w - 1)) == 0:                      # power-of-two width: shift/and
        col = lane & (w - 1)
        row = lane >> (w.bit_length() - 1)
    else:                                       # generic fallback
        col = lane % w
        row = lane // w

    offsets, masks = [], []
    for dy in (-1, 0, 1):
        for dx in (-1, 0, 1):
            offsets.append(dy * w + dx)
            conds = []
            if dy == -1:
                conds.append(row >= 1)
            if dy == 1:
                conds.append(row <= h - 2)
            if dx == -1:
                conds.append(col >= 1)
            if dx == 1:
                conds.append(col <= w - 2)
            if conds:
                m = conds[0]
                for c in conds[1:]:
                    m = m & c
                masks.append(jnp.where(m, 1.0, 0.0))   # (1, hw) f32 mask
            else:
                masks.append(None)                     # centre tap: no mask

    def conv3x3(x_img, w_taps):
        # x_img: (C, hw) value; w_taps: (9, Cout, C) ref.
        # tap_t[:, k] = x[:, k + o] masked to zero outside the image, then one
        # small MXU dot per tap accumulated in f32 (single GEMM equivalent).
        acc = None
        for t in range(9):
            o = offsets[t]
            tap = x_img if o == 0 else pltpu.roll(x_img, shift=(-o) % hw, axis=1)
            if masks[t] is not None:
                tap = tap * masks[t]                   # zero padding (XLU+VPU)
            p = jnp.dot(w_taps[t], tap, preferred_element_type=jnp.float32)
            acc = p if acc is None else acc + p
        return acc                                     # (Cout, hw) f32

    def bn_relu(ys, gamma, beta):
        # Train-mode BatchNorm over (N, H, W) with single-pass statistics.
        inv_m = 1.0 / float(len(ys) * hw)
        s1 = sum(jnp.sum(y, axis=1, keepdims=True) for y in ys)
        s2 = sum(jnp.sum(y * y, axis=1, keepdims=True) for y in ys)
        mean = s1 * inv_m
        var = s2 * inv_m - mean * mean                 # biased variance
        scale = gamma * lax.rsqrt(var + EPS)           # EUP rsqrt
        shift = beta - mean * scale
        return [jnp.maximum(y * scale + shift, 0.0) for y in ys]

    x_imgs = [x_ref[i] for i in range(n)]
    a1 = bn_relu([conv3x3(x, w1_ref) for x in x_imgs], bn_ref[0], bn_ref[1])
    a2 = bn_relu([conv3x3(a, w2_ref) for a in a1], bn_ref[2], bn_ref[3])
    for i in range(n):
        o_ref[i] = a2[i].astype(o_ref.dtype)


# ------------------------------ JAX-side wrapper ----------------------------- #

@jax.jit
def double_conv_forward(x_nchw, params):
    n, cin, h, w = x_nchw.shape
    cout = params["w1"].shape[0]
    hw = h * w

    # Free (contiguous) reshape only -- no activation transposes.
    x = x_nchw.reshape(n, cin, hw)

    # Tiny one-off tap-major weight relayout: (Cout,Cin,3,3) -> (9,Cout,Cin).
    w1 = jnp.transpose(params["w1"], (2, 3, 0, 1)).reshape(9, cout, cin)
    w2 = jnp.transpose(params["w2"], (2, 3, 0, 1)).reshape(9, cout, cout)
    # All per-channel BN params in a single small VMEM block.
    bn = jnp.stack([params["g1"], params["be1"],
                    params["g2"], params["be2"]]).reshape(4, cout, 1)

    flops = 2 * 9 * (cin + cout) * cout * n * hw + 16 * cout * n * hw
    bytes_accessed = 4 * (x.size + w1.size + w2.size + bn.size + n * cout * hw)

    out = pl.pallas_call(
        functools.partial(_double_conv_kernel, h=h, w=w),
        out_shape=jax.ShapeDtypeStruct((n, cout, hw), jnp.float32),
        grid=(1,),
        in_specs=[
            pl.BlockSpec((n, cin, hw), lambda i: (0, 0, 0)),
            pl.BlockSpec((9, cout, cin), lambda i: (0, 0, 0)),
            pl.BlockSpec((9, cout, cout), lambda i: (0, 0, 0)),
            pl.BlockSpec((4, cout, 1), lambda i: (0, 0, 0)),
        ],
        out_specs=pl.BlockSpec((n, cout, hw), lambda i: (0, 0, 0)),
        compiler_params=pltpu.CompilerParams(
            dimension_semantics=("arbitrary",)),
        cost_estimate=pl.CostEstimate(
            flops=flops, transcendentals=2 * cout,
            bytes_accessed=bytes_accessed),
    )(x, w1, w2, bn)

    return out.reshape(n, cout, h, w)                  # free reshape to NCHW


# -------------------------------- reference ---------------------------------- #

def _reference(x_nchw, p):
    def conv(x, wt, b):
        y = lax.conv_general_dilated(
            x, wt, window_strides=(1, 1), padding="SAME",
            dimension_numbers=("NCHW", "OIHW", "NCHW"))
        return y + b[None, :, None, None]

    def bn_relu(y, g, be):
        mean = jnp.mean(y, axis=(0, 2, 3), keepdims=True)
        var = jnp.mean(jnp.square(y - mean), axis=(0, 2, 3), keepdims=True)
        yh = (y - mean) / jnp.sqrt(var + EPS)
        return jnp.maximum(yh * g[None, :, None, None]
                           + be[None, :, None, None], 0.0)

    y = bn_relu(conv(x_nchw, p["w1"], p["b1"]), p["g1"], p["be1"])
    return bn_relu(conv(y, p["w2"], p["b2"]), p["g2"], p["be2"])


# ---------------------------------- main -------------------------------------- #

if __name__ == "__main__":
    N, IN_CH, OUT_CH, H, W = 2, 4, 8, 16, 16

    key = jax.random.PRNGKey(0)
    ks = jax.random.split(key, 9)
    params = {
        "w1": 0.1 * jax.random.normal(ks[0], (OUT_CH, IN_CH, 3, 3), jnp.float32),
        "b1": 0.1 * jax.random.normal(ks[1], (OUT_CH,), jnp.float32),
        "g1": 1.0 + 0.1 * jax.random.normal(ks[2], (OUT_CH,), jnp.float32),
        "be1": 0.1 * jax.random.normal(ks[3], (OUT_CH,), jnp.float32),
        "w2": 0.1 * jax.random.normal(ks[4], (OUT_CH, OUT_CH, 3, 3), jnp.float32),
        "b2": 0.1 * jax.random.normal(ks[5], (OUT_CH,), jnp.float32),
        "g2": 1.0 + 0.1 * jax.random.normal(ks[6], (OUT_CH,), jnp.float32),
        "be2": 0.1 * jax.random.normal(ks[7], (OUT_CH,), jnp.float32),
    }
    x = jax.random.normal(ks[8], (N, IN_CH, H, W), jnp.float32)

    out = jax.block_until_ready(double_conv_forward(x, params))
    ref = jax.block_until_ready(_reference(x, params))

    assert out.shape == (N, OUT_CH, H, W), out.shape
    assert jnp.allclose(out, ref, atol=1e-4, rtol=1e-4), (
        float(jnp.max(jnp.abs(out - ref))))
    print("KERNEL_OK")
</pallas_src>

<mosaic_0001>
module attributes {stable_mosaic.version = 11 : i64} {
  func.func @_double_conv_kernel(%arg0: i32, %arg1: memref<2x4x256xf32, #tpu.memory_space<vmem>>, %arg2: memref<9x8x4xf32, #tpu.memory_space<vmem>>, %arg3: memref<9x8x8xf32, #tpu.memory_space<vmem>>, %arg4: memref<4x8x1xf32, #tpu.memory_space<vmem>>, %arg5: memref<2x8x256xf32, #tpu.memory_space<vmem>>) attributes {dimension_semantics = [#tpu.dimension_semantics<arbitrary>], iteration_bounds = array<i64: 1>, scalar_prefetch = 0 : i64, scratch_operands = 0 : i64, tpu.core_type = #tpu.core_type<tc>, window_params = [{pipeline_mode = #tpu.pipeline_mode<synchronous>, transform_indices = @transform_0, window_bounds = array<i64: 2, 4, 256>}, {pipeline_mode = #tpu.pipeline_mode<synchronous>, transform_indices = @transform_1, window_bounds = array<i64: 9, 8, 4>}, {pipeline_mode = #tpu.pipeline_mode<synchronous>, transform_indices = @transform_2, window_bounds = array<i64: 9, 8, 8>}, {pipeline_mode = #tpu.pipeline_mode<synchronous>, transform_indices = @transform_3, window_bounds = array<i64: 4, 8, 1>}, {pipeline_mode = #tpu.pipeline_mode<synchronous>, transform_indices = @transform_4, window_bounds = array<i64: 2, 8, 256>}]} {
    %0 = tpu.iota {dimensions = array<i32: 1>} : vector<1x256xi32>
    %c15_i32 = arith.constant 15 : i32
    %1 = vector.broadcast %c15_i32 : i32 to vector<1x256xi32>
    %2 = arith.andi %0, %1 : vector<1x256xi32>
    %c4_i32 = arith.constant 4 : i32
    %3 = vector.broadcast %c4_i32 : i32 to vector<1x256xi32>
    %4 = arith.shrsi %0, %3 : vector<1x256xi32>
    %c1_i32 = arith.constant 1 : i32
    %5 = vector.broadcast %c1_i32 : i32 to vector<1x256xi32>
    %6 = arith.cmpi sge, %4, %5 : vector<1x256xi32>
    %c1_i32_0 = arith.constant 1 : i32
    %7 = vector.broadcast %c1_i32_0 : i32 to vector<1x256xi32>
    %8 = arith.cmpi sge, %2, %7 : vector<1x256xi32>
    %9 = arith.andi %6, %8 : vector<1x256xi1>
    %cst = arith.constant 1.000000e+00 : f32
    %cst_1 = arith.constant 0.000000e+00 : f32
    %10 = vector.broadcast %cst : f32 to vector<1x256xf32>
    %11 = vector.broadcast %cst_1 : f32 to vector<1x256xf32>
    %12 = arith.select %9, %10, %11 : vector<1x256xi1>, vector<1x256xf32>
    %c1_i32_2 = arith.constant 1 : i32
    %13 = vector.broadcast %c1_i32_2 : i32 to vector<1x256xi32>
    %14 = arith.cmpi sge, %4, %13 : vector<1x256xi32>
    %cst_3 = arith.constant 1.000000e+00 : f32
    %cst_4 = arith.constant 0.000000e+00 : f32
    %15 = vector.broadcast %cst_3 : f32 to vector<1x256xf32>
    %16 = vector.broadcast %cst_4 : f32 to vector<1x256xf32>
    %17 = arith.select %14, %15, %16 : vector<1x256xi1>, vector<1x256xf32>
    %c1_i32_5 = arith.constant 1 : i32
    %18 = vector.broadcast %c1_i32_5 : i32 to vector<1x256xi32>
    %19 = arith.cmpi sge, %4, %18 : vector<1x256xi32>
    %c14_i32 = arith.constant 14 : i32
    %20 = vector.broadcast %c14_i32 : i32 to vector<1x256xi32>
    %21 = arith.cmpi sle, %2, %20 : vector<1x256xi32>
    %22 = arith.andi %19, %21 : vector<1x256xi1>
    %cst_6 = arith.constant 1.000000e+00 : f32
    %cst_7 = arith.constant 0.000000e+00 : f32
    %23 = vector.broadcast %cst_6 : f32 to vector<1x256xf32>
    %24 = vector.broadcast %cst_7 : f32 to vector<1x256xf32>
    %25 = arith.select %22, %23, %24 : vector<1x256xi1>, vector<1x256xf32>
    %c1_i32_8 = arith.constant 1 : i32
    %26 = vector.broadcast %c1_i32_8 : i32 to vector<1x256xi32>
    %27 = arith.cmpi sge, %2, %26 : vector<1x256xi32>
    %cst_9 = arith.constant 1.000000e+00 : f32
    %cst_10 = arith.constant 0.000000e+00 : f32
    %28 = vector.broadcast %cst_9 : f32 to vector<1x256xf32>
    %29 = vector.broadcast %cst_10 : f32 to vector<1x256xf32>
    %30 = arith.select %27, %28, %29 : vector<1x256xi1>, vector<1x256xf32>
    %c14_i32_11 = arith.constant 14 : i32
    %31 = vector.broadcast %c14_i32_11 : i32 to vector<1x256xi32>
    %32 = arith.cmpi sle, %2, %31 : vector<1x256xi32>
    %cst_12 = arith.constant 1.000000e+00 : f32
    %cst_13 = arith.constant 0.000000e+00 : f32
    %33 = vector.broadcast %cst_12 : f32 to vector<1x256xf32>
    %34 = vector.broadcast %cst_13 : f32 to vector<1x256xf32>
    %35 = arith.select %32, %33, %34 : vector<1x256xi1>, vector<1x256xf32>
    %c14_i32_14 = arith.constant 14 : i32
    %36 = vector.broadcast %c14_i32_14 : i32 to vector<1x256xi32>
    %37 = arith.cmpi sle, %4, %36 : vector<1x256xi32>
    %c1_i32_15 = arith.constant 1 : i32
    %38 = vector.broadcast %c1_i32_15 : i32 to vector<1x256xi32>
    %39 = arith.cmpi sge, %2, %38 : vector<1x256xi32>
    %40 = arith.andi %37, %39 : vector<1x256xi1>
    %cst_16 = arith.constant 1.000000e+00 : f32
    %cst_17 = arith.constant 0.000000e+00 : f32
    %41 = vector.broadcast %cst_16 : f32 to vector<1x256xf32>
    %42 = vector.broadcast %cst_17 : f32 to vector<1x256xf32>
    %43 = arith.select %40, %41, %42 : vector<1x256xi1>, vector<1x256xf32>
    %c14_i32_18 = arith.constant 14 : i32
    %44 = vector.broadcast %c14_i32_18 : i32 to vector<1x256xi32>
    %45 = arith.cmpi sle, %4, %44 : vector<1x256xi32>
    %cst_19 = arith.constant 1.000000e+00 : f32
    %cst_20 = arith.constant 0.000000e+00 : f32
    %46 = vector.broadcast %cst_19 : f32 to vector<1x256xf32>
    %47 = vector.broadcast %cst_20 : f32 to vector<1x256xf32>
    %48 = arith.select %45, %46, %47 : vector<1x256xi1>, vector<1x256xf32>
    %c14_i32_21 = arith.constant 14 : i32
    %49 = vector.broadcast %c14_i32_21 : i32 to vector<1x256xi32>
    %50 = arith.cmpi sle, %4, %49 : vector<1x256xi32>
    %c14_i32_22 = arith.constant 14 : i32
    %51 = vector.broadcast %c14_i32_22 : i32 to vector<1x256xi32>
    %52 = arith.cmpi sle, %2, %51 : vector<1x256xi32>
    %53 = arith.andi %50, %52 : vector<1x256xi1>
    %cst_23 = arith.constant 1.000000e+00 : f32
    %cst_24 = arith.constant 0.000000e+00 : f32
    %54 = vector.broadcast %cst_23 : f32 to vector<1x256xf32>
    %55 = vector.broadcast %cst_24 : f32 to vector<1x256xf32>
    %56 = arith.select %53, %54, %55 : vector<1x256xi1>, vector<1x256xf32>
    %c0 = arith.constant 0 : index
    %c0_25 = arith.constant 0 : index
    %c0_26 = arith.constant 0 : index
    %57 = vector.load %arg1[%c0, %c0_25, %c0_26] : memref<2x4x256xf32, #tpu.memory_space<vmem>>, vector<1x4x256xf32>
    %58 = vector.shape_cast %57 : vector<1x4x256xf32> to vector<4x256xf32>
    %c1 = arith.constant 1 : index
    %c0_27 = arith.constant 0 : index
    %c0_28 = arith.constant 0 : index
    %59 = vector.load %arg1[%c1, %c0_27, %c0_28] : memref<2x4x256xf32, #tpu.memory_space<vmem>>, vector<1x4x256xf32>
    %60 = vector.shape_cast %59 : vector<1x4x256xf32> to vector<4x256xf32>
    %c17_i32 = arith.constant 17 : i32
    %61 = tpu.dynamic_rotate %58 by %c17_i32 dim 1 : vector<4x256xf32>, i32 -> vector<4x256xf32>
    %62 = vector.broadcast %12 : vector<1x256xf32> to vector<4x256xf32>
    %63 = arith.mulf %61, %62 : vector<4x256xf32>
    %c0_29 = arith.constant 0 : index
    %c0_30 = arith.constant 0 : index
    %c0_31 = arith.constant 0 : index
    %64 = vector.load %arg2[%c0_29, %c0_30, %c0_31] : memref<9x8x4xf32, #tpu.memory_space<vmem>>, vector<1x8x4xf32>
    %65 = vector.shape_cast %64 : vector<1x8x4xf32> to vector<8x4xf32>
    %cst_32 = arith.constant dense<0.000000e+00> : vector<8x256xf32>
    %66 = tpu.matmul %65, %63, %cst_32 {dimension_numbers = #tpu.dot_dimension_numbers<[1], [0], [0], [1], [0, 0, 1, 1], [], []>} : vector<8x4xf32>, vector<4x256xf32>, vector<8x256xf32> -> vector<8x256xf32>
    %c16_i32 = arith.constant 16 : i32
    %67 = tpu.dynamic_rotate %58 by %c16_i32 dim 1 : vector<4x256xf32>, i32 -> vector<4x256xf32>
    %68 = vector.broadcast %17 : vector<1x256xf32> to vector<4x256xf32>
    %69 = arith.mulf %67, %68 : vector<4x256xf32>
    %c1_33 = arith.constant 1 : index
    %c0_34 = arith.constant 0 : index
    %c0_35 = arith.constant 0 : index
    %70 = vector.load %arg2[%c1_33, %c0_34, %c0_35] : memref<9x8x4xf32, #tpu.memory_space<vmem>>, vector<1x8x4xf32>
    %71 = vector.shape_cast %70 : vector<1x8x4xf32> to vector<8x4xf32>
    %cst_36 = arith.constant dense<0.000000e+00> : vector<8x256xf32>
    %72 = tpu.matmul %71, %69, %cst_36 {dimension_numbers = #tpu.dot_dimension_numbers<[1], [0], [0], [1], [0, 0, 1, 1], [], []>} : vector<8x4xf32>, vector<4x256xf32>, vector<8x256xf32> -> vector<8x256xf32>
    %73 = arith.addf %66, %72 : vector<8x256xf32>
    %c15_i32_37 = arith.constant 15 : i32
    %74 = tpu.dynamic_rotate %58 by %c15_i32_37 dim 1 : vector<4x256xf32>, i32 -> vector<4x256xf32>
    %75 = vector.broadcast %25 : vector<1x256xf32> to vector<4x256xf32>
    %76 = arith.mulf %74, %75 : vector<4x256xf32>
    %c2 = arith.constant 2 : index
    %c0_38 = arith.constant 0 : index
    %c0_39 = arith.constant 0 : index
    %77 = vector.load %arg2[%c2, %c0_38, %c0_39] : memref<9x8x4xf32, #tpu.memory_space<vmem>>, vector<1x8x4xf32>
    %78 = vector.shape_cast %77 : vector<1x8x4xf32> to vector<8x4xf32>
    %cst_40 = arith.constant dense<0.000000e+00> : vector<8x256xf32>
    %79 = tpu.matmul %78, %76, %cst_40 {dimension_numbers = #tpu.dot_dimension_numbers<[1], [0], [0], [1], [0, 0, 1, 1], [], []>} : vector<8x4xf32>, vector<4x256xf32>, vector<8x256xf32> -> vector<8x256xf32>
    %80 = arith.addf %73, %79 : vector<8x256xf32>
    %c1_i32_41 = arith.constant 1 : i32
    %81 = tpu.dynamic_rotate %58 by %c1_i32_41 dim 1 : vector<4x256xf32>, i32 -> vector<4x256xf32>
    %82 = vector.broadcast %30 : vector<1x256xf32> to vector<4x256xf32>
    %83 = arith.mulf %81, %82 : vector<4x256xf32>
    %c3 = arith.constant 3 : index
    %c0_42 = arith.constant 0 : index
    %c0_43 = arith.constant 0 : index
    %84 = vector.load %arg2[%c3, %c0_42, %c0_43] : memref<9x8x4xf32, #tpu.memory_space<vmem>>, vector<1x8x4xf32>
    %85 = vector.shape_cast %84 : vector<1x8x4xf32> to vector<8x4xf32>
    %cst_44 = arith.constant dense<0.000000e+00> : vector<8x256xf32>
    %86 = tpu.matmul %85, %83, %cst_44 {dimension_numbers = #tpu.dot_dimension_numbers<[1], [0], [0], [1], [0, 0, 1, 1], [], []>} : vector<8x4xf32>, vector<4x256xf32>, vector<8x256xf32> -> vector<8x256xf32>
    %87 = arith.addf %80, %86 : vector<8x256xf32>
    %c4 = arith.constant 4 : index
    %c0_45 = arith.constant 0 : index
    %c0_46 = arith.constant 0 : index
    %88 = vector.load %arg2[%c4, %c0_45, %c0_46] : memref<9x8x4xf32, #tpu.memory_space<vmem>>, vector<1x8x4xf32>
    %89 = vector.shape_cast %88 : vector<1x8x4xf32> to vector<8x4xf32>
    %cst_47 = arith.constant dense<0.000000e+00> : vector<8x256xf32>
    %90 = tpu.matmul %89, %58, %cst_47 {dimension_numbers = #tpu.dot_dimension_numbers<[1], [0], [0], [1], [0, 0, 1, 1], [], []>} : vector<8x4xf32>, vector<4x256xf32>, vector<8x256xf32> -> vector<8x256xf32>
    %91 = arith.addf %87, %90 : vector<8x256xf32>
    %c255_i32 = arith.constant 255 : i32
    %92 = tpu.dynamic_rotate %58 by %c255_i32 dim 1 : vector<4x256xf32>, i32 -> vector<4x256xf32>
    %93 = vector.broadcast %35 : vector<1x256xf32> to vector<4x256xf32>
    %94 = arith.mulf %92, %93 : vector<4x256xf32>
    %c5 = arith.constant 5 : index
    %c0_48 = arith.constant 0 : index
    %c0_49 = arith.constant 0 : index
    %95 = vector.load %arg2[%c5, %c0_48, %c0_49] : memref<9x8x4xf32, #tpu.memory_space<vmem>>, vector<1x8x4xf32>
    %96 = vector.shape_cast %95 : vector<1x8x4xf32> to vector<8x4xf32>
    %cst_50 = arith.constant dense<0.000000e+00> : vector<8x256xf32>
    %97 = tpu.matmul %96, %94, %cst_50 {dimension_numbers = #tpu.dot_dimension_numbers<[1], [0], [0], [1], [0, 0, 1, 1], [], []>} : vector<8x4xf32>, vector<4x256xf32>, vector<8x256xf32> -> vector<8x256xf32>
    %98 = arith.addf %91, %97 : vector<8x256xf32>
    %c241_i32 = arith.constant 241 : i32
    %99 = tpu.dynamic_rotate %58 by %c241_i32 dim 1 : vector<4x256xf32>, i32 -> vector<4x256xf32>
    %100 = vector.broadcast %43 : vector<1x256xf32> to vector<4x256xf32>
    %101 = arith.mulf %99, %100 : vector<4x256xf32>
    %c6 = arith.constant 6 : index
    %c0_51 = arith.constant 0 : index
    %c0_52 = arith.constant 0 : index
    %102 = vector.load %arg2[%c6, %c0_51, %c0_52] : memref<9x8x4xf32, #tpu.memory_space<vmem>>, vector<1x8x4xf32>
    %103 = vector.shape_cast %102 : vector<1x8x4xf32> to vector<8x4xf32>
    %cst_53 = arith.constant dense<0.000000e+00> : vector<8x256xf32>
    %104 = tpu.matmul %103, %101, %cst_53 {dimension_numbers = #tpu.dot_dimension_numbers<[1], [0], [0], [1], [0, 0, 1, 1], [], []>} : vector<8x4xf32>, vector<4x256xf32>, vector<8x256xf32> -> vector<8x256xf32>
    %105 = arith.addf %98, %104 : vector<8x256xf32>
    %c240_i32 = arith.constant 240 : i32
    %106 = tpu.dynamic_rotate %58 by %c240_i32 dim 1 : vector<4x256xf32>, i32 -> vector<4x256xf32>
    %107 = vector.broadcast %48 : vector<1x256xf32> to vector<4x256xf32>
    %108 = arith.mulf %106, %107 : vector<4x256xf32>
    %c7 = arith.constant 7 : index
    %c0_54 = arith.constant 0 : index
    %c0_55 = arith.constant 0 : index
    %109 = vector.load %arg2[%c7, %c0_54, %c0_55] : memref<9x8x4xf32, #tpu.memory_space<vmem>>, vector<1x8x4xf32>
    %110 = vector.shape_cast %109 : vector<1x8x4xf32> to vector<8x4xf32>
    %cst_56 = arith.constant dense<0.000000e+00> : vector<8x256xf32>
    %111 = tpu.matmul %110, %108, %cst_56 {dimension_numbers = #tpu.dot_dimension_numbers<[1], [0], [0], [1], [0, 0, 1, 1], [], []>} : vector<8x4xf32>, vector<4x256xf32>, vector<8x256xf32> -> vector<8x256xf32>
    %112 = arith.addf %105, %111 : vector<8x256xf32>
    %c239_i32 = arith.constant 239 : i32
    %113 = tpu.dynamic_rotate %58 by %c239_i32 dim 1 : vector<4x256xf32>, i32 -> vector<4x256xf32>
    %114 = vector.broadcast %56 : vector<1x256xf32> to vector<4x256xf32>
    %115 = arith.mulf %113, %114 : vector<4x256xf32>
    %c8 = arith.constant 8 : index
    %c0_57 = arith.constant 0 : index
    %c0_58 = arith.constant 0 : index
    %116 = vector.load %arg2[%c8, %c0_57, %c0_58] : memref<9x8x4xf32, #tpu.memory_space<vmem>>, vector<1x8x4xf32>
    %117 = vector.shape_cast %116 : vector<1x8x4xf32> to vector<8x4xf32>
    %cst_59 = arith.constant dense<0.000000e+00> : vector<8x256xf32>
    %118 = tpu.matmul %117, %115, %cst_59 {dimension_numbers = #tpu.dot_dimension_numbers<[1], [0], [0], [1], [0, 0, 1, 1], [], []>} : vector<8x4xf32>, vector<4x256xf32>, vector<8x256xf32> -> vector<8x256xf32>
    %119 = arith.addf %112, %118 : vector<8x256xf32>
    %c17_i32_60 = arith.constant 17 : i32
    %120 = tpu.dynamic_rotate %60 by %c17_i32_60 dim 1 : vector<4x256xf32>, i32 -> vector<4x256xf32>
    %121 = vector.broadcast %12 : vector<1x256xf32> to vector<4x256xf32>
    %122 = arith.mulf %120, %121 : vector<4x256xf32>
    %c0_61 = arith.constant 0 : index
    %c0_62 = arith.constant 0 : index
    %c0_63 = arith.constant 0 : index
    %123 = vector.load %arg2[%c0_61, %c0_62, %c0_63] : memref<9x8x4xf32, #tpu.memory_space<vmem>>, vector<1x8x4xf32>
    %124 = vector.shape_cast %123 : vector<1x8x4xf32> to vector<8x4xf32>
    %cst_64 = arith.constant dense<0.000000e+00> : vector<8x256xf32>
    %125 = tpu.matmul %124, %122, %cst_64 {dimension_numbers = #tpu.dot_dimension_numbers<[1], [0], [0], [1], [0, 0, 1, 1], [], []>} : vector<8x4xf32>, vector<4x256xf32>, vector<8x256xf32> -> vector<8x256xf32>
    %c16_i32_65 = arith.constant 16 : i32
    %126 = tpu.dynamic_rotate %60 by %c16_i32_65 dim 1 : vector<4x256xf32>, i32 -> vector<4x256xf32>
    %127 = vector.broadcast %17 : vector<1x256xf32> to vector<4x256xf32>
    %128 = arith.mulf %126, %127 : vector<4x256xf32>
    %c1_66 = arith.constant 1 : index
    %c0_67 = arith.constant 0 : index
    %c0_68 = arith.constant 0 : index
    %129 = vector.load %arg2[%c1_66, %c0_67, %c0_68] : memref<9x8x4xf32, #tpu.memory_space<vmem>>, vector<1x8x4xf32>
    %130 = vector.shape_cast %129 : vector<1x8x4xf32> to vector<8x4xf32>
    %cst_69 = arith.constant dense<0.000000e+00> : vector<8x256xf32>
    %131 = tpu.matmul %130, %128, %cst_69 {dimension_numbers = #tpu.dot_dimension_numbers<[1], [0], [0], [1], [0, 0, 1, 1], [], []>} : vector<8x4xf32>, vector<4x256xf32>, vector<8x256xf32> -> vector<8x256xf32>
    %132 = arith.addf %125, %131 : vector<8x256xf32>
    %c15_i32_70 = arith.constant 15 : i32
    %133 = tpu.dynamic_rotate %60 by %c15_i32_70 dim 1 : vector<4x256xf32>, i32 -> vector<4x256xf32>
    %134 = vector.broadcast %25 : vector<1x256xf32> to vector<4x256xf32>
    %135 = arith.mulf %133, %134 : vector<4x256xf32>
    %c2_71 = arith.constant 2 : index
    %c0_72 = arith.constant 0 : index
    %c0_73 = arith.constant 0 : index
    %136 = vector.load %arg2[%c2_71, %c0_72, %c0_73] : memref<9x8x4xf32, #tpu.memory_space<vmem>>, vector<1x8x4xf32>
    %137 = vector.shape_cast %136 : vector<1x8x4xf32> to vector<8x4xf32>
    %cst_74 = arith.constant dense<0.000000e+00> : vector<8x256xf32>
    %138 = tpu.matmul %137, %135, %cst_74 {dimension_numbers = #tpu.dot_dimension_numbers<[1], [0], [0], [1], [0, 0, 1, 1], [], []>} : vector<8x4xf32>, vector<4x256xf32>, vector<8x256xf32> -> vector<8x256xf32>
    %139 = arith.addf %132, %138 : vector<8x256xf32>
    %c1_i32_75 = arith.constant 1 : i32
    %140 = tpu.dynamic_rotate %60 by %c1_i32_75 dim 1 : vector<4x256xf32>, i32 -> vector<4x256xf32>
    %141 = vector.broadcast %30 : vector<1x256xf32> to vector<4x256xf32>
    %142 = arith.mulf %140, %141 : vector<4x256xf32>
    %c3_76 = arith.constant 3 : index
    %c0_77 = arith.constant 0 : index
    %c0_78 = arith.constant 0 : index
    %143 = vector.load %arg2[%c3_76, %c0_77, %c0_78] : memref<9x8x4xf32, #tpu.memory_space<vmem>>, vector<1x8x4xf32>
    %144 = vector.shape_cast %143 : vector<1x8x4xf32> to vector<8x4xf32>
    %cst_79 = arith.constant dense<0.000000e+00> : vector<8x256xf32>
    %145 = tpu.matmul %144, %142, %cst_79 {dimension_numbers = #tpu.dot_dimension_numbers<[1], [0], [0], [1], [0, 0, 1, 1], [], []>} : vector<8x4xf32>, vector<4x256xf32>, vector<8x256xf32> -> vector<8x256xf32>
    %146 = arith.addf %139, %145 : vector<8x256xf32>
    %c4_80 = arith.constant 4 : index
    %c0_81 = arith.constant 0 : index
    %c0_82 = arith.constant 0 : index
    %147 = vector.load %arg2[%c4_80, %c0_81, %c0_82] : memref<9x8x4xf32, #tpu.memory_space<vmem>>, vector<1x8x4xf32>
    %148 = vector.shape_cast %147 : vector<1x8x4xf32> to vector<8x4xf32>
    %cst_83 = arith.constant dense<0.000000e+00> : vector<8x256xf32>
    %149 = tpu.matmul %148, %60, %cst_83 {dimension_numbers = #tpu.dot_dimension_numbers<[1], [0], [0], [1], [0, 0, 1, 1], [], []>} : vector<8x4xf32>, vector<4x256xf32>, vector<8x256xf32> -> vector<8x256xf32>
    %150 = arith.addf %146, %149 : vector<8x256xf32>
    %c255_i32_84 = arith.constant 255 : i32
    %151 = tpu.dynamic_rotate %60 by %c255_i32_84 dim 1 : vector<4x256xf32>, i32 -> vector<4x256xf32>
    %152 = vector.broadcast %35 : vector<1x256xf32> to vector<4x256xf32>
    %153 = arith.mulf %151, %152 : vector<4x256xf32>
    %c5_85 = arith.constant 5 : index
    %c0_86 = arith.constant 0 : index
    %c0_87 = arith.constant 0 : index
    %154 = vector.load %arg2[%c5_85, %c0_86, %c0_87] : memref<9x8x4xf32, #tpu.memory_space<vmem>>, vector<1x8x4xf32>
    %155 = vector.shape_cast %154 : vector<1x8x4xf32> to vector<8x4xf32>
    %cst_88 = arith.constant dense<0.000000e+00> : vector<8x256xf32>
    %156 = tpu.matmul %155, %153, %cst_88 {dimension_numbers = #tpu.dot_dimension_numbers<[1], [0], [0], [1], [0, 0, 1, 1], [], []>} : vector<8x4xf32>, vector<4x256xf32>, vector<8x256xf32> -> vector<8x256xf32>
    %157 = arith.addf %150, %156 : vector<8x256xf32>
    %c241_i32_89 = arith.constant 241 : i32
    %158 = tpu.dynamic_rotate %60 by %c241_i32_89 dim 1 : vector<4x256xf32>, i32 -> vector<4x256xf32>
    %159 = vector.broadcast %43 : vector<1x256xf32> to vector<4x256xf32>
    %160 = arith.mulf %158, %159 : vector<4x256xf32>
    %c6_90 = arith.constant 6 : index
    %c0_91 = arith.constant 0 : index
    %c0_92 = arith.constant 0 : index
    %161 = vector.load %arg2[%c6_90, %c0_91, %c0_92] : memref<9x8x4xf32, #tpu.memory_space<vmem>>, vector<1x8x4xf32>
    %162 = vector.shape_cast %161 : vector<1x8x4xf32> to vector<8x4xf32>
    %cst_93 = arith.constant dense<0.000000e+00> : vector<8x256xf32>
    %163 = tpu.matmul %162, %160, %cst_93 {dimension_numbers = #tpu.dot_dimension_numbers<[1], [0], [0], [1], [0, 0, 1, 1], [], []>} : vector<8x4xf32>, vector<4x256xf32>, vector<8x256xf32> -> vector<8x256xf32>
    %164 = arith.addf %157, %163 : vector<8x256xf32>
    %c240_i32_94 = arith.constant 240 : i32
    %165 = tpu.dynamic_rotate %60 by %c240_i32_94 dim 1 : vector<4x256xf32>, i32 -> vector<4x256xf32>
    %166 = vector.broadcast %48 : vector<1x256xf32> to vector<4x256xf32>
    %167 = arith.mulf %165, %166 : vector<4x256xf32>
    %c7_95 = arith.constant 7 : index
    %c0_96 = arith.constant 0 : index
    %c0_97 = arith.constant 0 : index
    %168 = vector.load %arg2[%c7_95, %c0_96, %c0_97] : memref<9x8x4xf32, #tpu.memory_space<vmem>>, vector<1x8x4xf32>
    %169 = vector.shape_cast %168 : vector<1x8x4xf32> to vector<8x4xf32>
    %cst_98 = arith.constant dense<0.000000e+00> : vector<8x256xf32>
    %170 = tpu.matmul %169, %167, %cst_98 {dimension_numbers = #tpu.dot_dimension_numbers<[1], [0], [0], [1], [0, 0, 1, 1], [], []>} : vector<8x4xf32>, vector<4x256xf32>, vector<8x256xf32> -> vector<8x256xf32>
    %171 = arith.addf %164, %170 : vector<8x256xf32>
    %c239_i32_99 = arith.constant 239 : i32
    %172 = tpu.dynamic_rotate %60 by %c239_i32_99 dim 1 : vector<4x256xf32>, i32 -> vector<4x256xf32>
    %173 = vector.broadcast %56 : vector<1x256xf32> to vector<4x256xf32>
    %174 = arith.mulf %172, %173 : vector<4x256xf32>
    %c8_100 = arith.constant 8 : index
    %c0_101 = arith.constant 0 : index
    %c0_102 = arith.constant 0 : index
    %175 = vector.load %arg2[%c8_100, %c0_101, %c0_102] : memref<9x8x4xf32, #tpu.memory_space<vmem>>, vector<1x8x4xf32>
    %176 = vector.shape_cast %175 : vector<1x8x4xf32> to vector<8x4xf32>
    %cst_103 = arith.constant dense<0.000000e+00> : vector<8x256xf32>
    %177 = tpu.matmul %176, %174, %cst_103 {dimension_numbers = #tpu.dot_dimension_numbers<[1], [0], [0], [1], [0, 0, 1, 1], [], []>} : vector<8x4xf32>, vector<4x256xf32>, vector<8x256xf32> -> vector<8x256xf32>
    %178 = arith.addf %171, %177 : vector<8x256xf32>
    %c0_104 = arith.constant 0 : index
    %c0_105 = arith.constant 0 : index
    %c0_106 = arith.constant 0 : index
    %179 = vector.load %arg4[%c0_104, %c0_105, %c0_106] : memref<4x8x1xf32, #tpu.memory_space<vmem>>, vector<1x8x1xf32>
    %180 = vector.shape_cast %179 : vector<1x8x1xf32> to vector<8x1xf32>
    %c1_107 = arith.constant 1 : index
    %c0_108 = arith.constant 0 : index
    %c0_109 = arith.constant 0 : index
    %181 = vector.load %arg4[%c1_107, %c0_108, %c0_109] : memref<4x8x1xf32, #tpu.memory_space<vmem>>, vector<1x8x1xf32>
    %182 = vector.shape_cast %181 : vector<1x8x1xf32> to vector<8x1xf32>
    %cst_110 = arith.constant dense<0.000000e+00> : vector<8xf32>
    %183 = vector.multi_reduction <add>, %119, %cst_110 [1] : vector<8x256xf32> to vector<8xf32>
    %184 = vector.shape_cast %183 : vector<8xf32> to vector<8x1xf32>
    %cst_111 = arith.constant 0.000000e+00 : f32
    %185 = vector.broadcast %cst_111 : f32 to vector<8x1xf32>
    %186 = arith.addf %185, %184 : vector<8x1xf32>
    %cst_112 = arith.constant dense<0.000000e+00> : vector<8xf32>
    %187 = vector.multi_reduction <add>, %178, %cst_112 [1] : vector<8x256xf32> to vector<8xf32>
    %188 = vector.shape_cast %187 : vector<8xf32> to vector<8x1xf32>
    %189 = arith.addf %186, %188 : vector<8x1xf32>
    %190 = arith.mulf %119, %119 : vector<8x256xf32>
    %cst_113 = arith.constant dense<0.000000e+00> : vector<8xf32>
    %191 = vector.multi_reduction <add>, %190, %cst_113 [1] : vector<8x256xf32> to vector<8xf32>
    %192 = vector.shape_cast %191 : vector<8xf32> to vector<8x1xf32>
    %cst_114 = arith.constant 0.000000e+00 : f32
    %193 = vector.broadcast %cst_114 : f32 to vector<8x1xf32>
    %194 = arith.addf %193, %192 : vector<8x1xf32>
    %195 = arith.mulf %178, %178 : vector<8x256xf32>
    %cst_115 = arith.constant dense<0.000000e+00> : vector<8xf32>
    %196 = vector.multi_reduction <add>, %195, %cst_115 [1] : vector<8x256xf32> to vector<8xf32>
    %197 = vector.shape_cast %196 : vector<8xf32> to vector<8x1xf32>
    %198 = arith.addf %194, %197 : vector<8x1xf32>
    %cst_116 = arith.constant 0.001953125 : f32
    %199 = vector.broadcast %cst_116 : f32 to vector<8x1xf32>
    %200 = arith.mulf %189, %199 : vector<8x1xf32>
    %cst_117 = arith.constant 0.001953125 : f32
    %201 = vector.broadcast %cst_117 : f32 to vector<8x1xf32>
    %202 = arith.mulf %198, %201 : vector<8x1xf32>
    %203 = arith.mulf %200, %200 : vector<8x1xf32>
    %204 = arith.subf %202, %203 : vector<8x1xf32>
    %cst_118 = arith.constant 9.99999974E-6 : f32
    %205 = vector.broadcast %cst_118 : f32 to vector<8x1xf32>
    %206 = arith.addf %204, %205 : vector<8x1xf32>
    %207 = math.rsqrt %206 : vector<8x1xf32>
    %208 = arith.mulf %180, %207 : vector<8x1xf32>
    %209 = arith.mulf %200, %208 : vector<8x1xf32>
    %210 = arith.subf %182, %209 : vector<8x1xf32>
    %211 = vector.broadcast %208 : vector<8x1xf32> to vector<8x256xf32>
    %212 = arith.mulf %119, %211 : vector<8x256xf32>
    %213 = vector.broadcast %210 : vector<8x1xf32> to vector<8x256xf32>
    %214 = arith.addf %212, %213 : vector<8x256xf32>
    %cst_119 = arith.constant 0.000000e+00 : f32
    %215 = vector.broadcast %cst_119 : f32 to vector<8x256xf32>
    %216 = arith.maximumf %214, %215 : vector<8x256xf32>
    %217 = vector.broadcast %208 : vector<8x1xf32> to vector<8x256xf32>
    %218 = arith.mulf %178, %217 : vector<8x256xf32>
    %219 = vector.broadcast %210 : vector<8x1xf32> to vector<8x256xf32>
    %220 = arith.addf %218, %219 : vector<8x256xf32>
    %cst_120 = arith.constant 0.000000e+00 : f32
    %221 = vector.broadcast %cst_120 : f32 to vector<8x256xf32>
    %222 = arith.maximumf %220, %221 : vector<8x256xf32>
    %c17_i32_121 = arith.constant 17 : i32
    %223 = tpu.dynamic_rotate %216 by %c17_i32_121 dim 1 : vector<8x256xf32>, i32 -> vector<8x256xf32>
    %224 = vector.broadcast %12 : vector<1x256xf32> to vector<8x256xf32>
    %225 = arith.mulf %223, %224 : vector<8x256xf32>
    %c0_122 = arith.constant 0 : index
    %c0_123 = arith.constant 0 : index
    %c0_124 = arith.constant 0 : index
    %226 = vector.load %arg3[%c0_122, %c0_123, %c0_124] : memref<9x8x8xf32, #tpu.memory_space<vmem>>, vector<1x8x8xf32>
    %227 = vector.shape_cast %226 : vector<1x8x8xf32> to vector<8x8xf32>
    %cst_125 = arith.constant dense<0.000000e+00> : vector<8x256xf32>
    %228 = tpu.matmul %227, %225, %cst_125 {dimension_numbers = #tpu.dot_dimension_numbers<[1], [0], [0], [1], [0, 0, 1, 1], [], []>} : vector<8x8xf32>, vector<8x256xf32>, vector<8x256xf32> -> vector<8x256xf32>
    %c16_i32_126 = arith.constant 16 : i32
    %229 = tpu.dynamic_rotate %216 by %c16_i32_126 dim 1 : vector<8x256xf32>, i32 -> vector<8x256xf32>
    %230 = vector.broadcast %17 : vector<1x256xf32> to vector<8x256xf32>
    %231 = arith.mulf %229, %230 : vector<8x256xf32>
    %c1_127 = arith.constant 1 : index
    %c0_128 = arith.constant 0 : index
    %c0_129 = arith.constant 0 : index
    %232 = vector.load %arg3[%c1_127, %c0_128, %c0_129] : memref<9x8x8xf32, #tpu.memory_space<vmem>>, vector<1x8x8xf32>
    %233 = vector.shape_cast %232 : vector<1x8x8xf32> to vector<8x8xf32>
    %cst_130 = arith.constant dense<0.000000e+00> : vector<8x256xf32>
    %234 = tpu.matmul %233, %231, %cst_130 {dimension_numbers = #tpu.dot_dimension_numbers<[1], [0], [0], [1], [0, 0, 1, 1], [], []>} : vector<8x8xf32>, vector<8x256xf32>, vector<8x256xf32> -> vector<8x256xf32>
    %235 = arith.addf %228, %234 : vector<8x256xf32>
    %c15_i32_131 = arith.constant 15 : i32
    %236 = tpu.dynamic_rotate %216 by %c15_i32_131 dim 1 : vector<8x256xf32>, i32 -> vector<8x256xf32>
    %237 = vector.broadcast %25 : vector<1x256xf32> to vector<8x256xf32>
    %238 = arith.mulf %236, %237 : vector<8x256xf32>
    %c2_132 = arith.constant 2 : index
    %c0_133 = arith.constant 0 : index
    %c0_134 = arith.constant 0 : index
    %239 = vector.load %arg3[%c2_132, %c0_133, %c0_134] : memref<9x8x8xf32, #tpu.memory_space<vmem>>, vector<1x8x8xf32>
    %240 = vector.shape_cast %239 : vector<1x8x8xf32> to vector<8x8xf32>
    %cst_135 = arith.constant dense<0.000000e+00> : vector<8x256xf32>
    %241 = tpu.matmul %240, %238, %cst_135 {dimension_numbers = #tpu.dot_dimension_numbers<[1], [0], [0], [1], [0, 0, 1, 1], [], []>} : vector<8x8xf32>, vector<8x256xf32>, vector<8x256xf32> -> vector<8x256xf32>
    %242 = arith.addf %235, %241 : vector<8x256xf32>
    %c1_i32_136 = arith.constant 1 : i32
    %243 = tpu.dynamic_rotate %216 by %c1_i32_136 dim 1 : vector<8x256xf32>, i32 -> vector<8x256xf32>
    %244 = vector.broadcast %30 : vector<1x256xf32> to vector<8x256xf32>
    %245 = arith.mulf %243, %244 : vector<8x256xf32>
    %c3_137 = arith.constant 3 : index
    %c0_138 = arith.constant 0 : index
    %c0_139 = arith.constant 0 : index
    %246 = vector.load %arg3[%c3_137, %c0_138, %c0_139] : memref<9x8x8xf32, #tpu.memory_space<vmem>>, vector<1x8x8xf32>
    %247 = vector.shape_cast %246 : vector<1x8x8xf32> to vector<8x8xf32>
    %cst_140 = arith.constant dense<0.000000e+00> : vector<8x256xf32>
    %248 = tpu.matmul %247, %245, %cst_140 {dimension_numbers = #tpu.dot_dimension_numbers<[1], [0], [0], [1], [0, 0, 1, 1], [], []>} : vector<8x8xf32>, vector<8x256xf32>, vector<8x256xf32> -> vector<8x256xf32>
    %249 = arith.addf %242, %248 : vector<8x256xf32>
    %c4_141 = arith.constant 4 : index
    %c0_142 = arith.constant 0 : index
    %c0_143 = arith.constant 0 : index
    %250 = vector.load %arg3[%c4_141, %c0_142, %c0_143] : memref<9x8x8xf32, #tpu.memory_space<vmem>>, vector<1x8x8xf32>
    %251 = vector.shape_cast %250 : vector<1x8x8xf32> to vector<8x8xf32>
    %cst_144 = arith.constant dense<0.000000e+00> : vector<8x256xf32>
    %252 = tpu.matmul %251, %216, %cst_144 {dimension_numbers = #tpu.dot_dimension_numbers<[1], [0], [0], [1], [0, 0, 1, 1], [], []>} : vector<8x8xf32>, vector<8x256xf32>, vector<8x256xf32> -> vector<8x256xf32>
    %253 = arith.addf %249, %252 : vector<8x256xf32>
    %c255_i32_145 = arith.constant 255 : i32
    %254 = tpu.dynamic_rotate %216 by %c255_i32_145 dim 1 : vector<8x256xf32>, i32 -> vector<8x256xf32>
    %255 = vector.broadcast %35 : vector<1x256xf32> to vector<8x256xf32>
    %256 = arith.mulf %254, %255 : vector<8x256xf32>
    %c5_146 = arith.constant 5 : index
    %c0_147 = arith.constant 0 : index
    %c0_148 = arith.constant 0 : index
    %257 = vector.load %arg3[%c5_146, %c0_147, %c0_148] : memref<9x8x8xf32, #tpu.memory_space<vmem>>, vector<1x8x8xf32>
    %258 = vector.shape_cast %257 : vector<1x8x8xf32> to vector<8x8xf32>
    %cst_149 = arith.constant dense<0.000000e+00> : vector<8x256xf32>
    %259 = tpu.matmul %258, %256, %cst_149 {dimension_numbers = #tpu.dot_dimension_numbers<[1], [0], [0], [1], [0, 0, 1, 1], [], []>} : vector<8x8xf32>, vector<8x256xf32>, vector<8x256xf32> -> vector<8x256xf32>
    %260 = arith.addf %253, %259 : vector<8x256xf32>
    %c241_i32_150 = arith.constant 241 : i32
    %261 = tpu.dynamic_rotate %216 by %c241_i32_150 dim 1 : vector<8x256xf32>, i32 -> vector<8x256xf32>
    %262 = vector.broadcast %43 : vector<1x256xf32> to vector<8x256xf32>
    %263 = arith.mulf %261, %262 : vector<8x256xf32>
    %c6_151 = arith.constant 6 : index
    %c0_152 = arith.constant 0 : index
    %c0_153 = arith.constant 0 : index
    %264 = vector.load %arg3[%c6_151, %c0_152, %c0_153] : memref<9x8x8xf32, #tpu.memory_space<vmem>>, vector<1x8x8xf32>
    %265 = vector.shape_cast %264 : vector<1x8x8xf32> to vector<8x8xf32>
    %cst_154 = arith.constant dense<0.000000e+00> : vector<8x256xf32>
    %266 = tpu.matmul %265, %263, %cst_154 {dimension_numbers = #tpu.dot_dimension_numbers<[1], [0], [0], [1], [0, 0, 1, 1], [], []>} : vector<8x8xf32>, vector<8x256xf32>, vector<8x256xf32> -> vector<8x256xf32>
    %267 = arith.addf %260, %266 : vector<8x256xf32>
    %c240_i32_155 = arith.constant 240 : i32
    %268 = tpu.dynamic_rotate %216 by %c240_i32_155 dim 1 : vector<8x256xf32>, i32 -> vector<8x256xf32>
    %269 = vector.broadcast %48 : vector<1x256xf32> to vector<8x256xf32>
    %270 = arith.mulf %268, %269 : vector<8x256xf32>
    %c7_156 = arith.constant 7 : index
    %c0_157 = arith.constant 0 : index
    %c0_158 = arith.constant 0 : index
    %271 = vector.load %arg3[%c7_156, %c0_157, %c0_158] : memref<9x8x8xf32, #tpu.memory_space<vmem>>, vector<1x8x8xf32>
    %272 = vector.shape_cast %271 : vector<1x8x8xf32> to vector<8x8xf32>
    %cst_159 = arith.constant dense<0.000000e+00> : vector<8x256xf32>
    %273 = tpu.matmul %272, %270, %cst_159 {dimension_numbers = #tpu.dot_dimension_numbers<[1], [0], [0], [1], [0, 0, 1, 1], [], []>} : vector<8x8xf32>, vector<8x256xf32>, vector<8x256xf32> -> vector<8x256xf32>
    %274 = arith.addf %267, %273 : vector<8x256xf32>
    %c239_i32_160 = arith.constant 239 : i32
    %275 = tpu.dynamic_rotate %216 by %c239_i32_160 dim 1 : vector<8x256xf32>, i32 -> vector<8x256xf32>
    %276 = vector.broadcast %56 : vector<1x256xf32> to vector<8x256xf32>
    %277 = arith.mulf %275, %276 : vector<8x256xf32>
    %c8_161 = arith.constant 8 : index
    %c0_162 = arith.constant 0 : index
    %c0_163 = arith.constant 0 : index
    %278 = vector.load %arg3[%c8_161, %c0_162, %c0_163] : memref<9x8x8xf32, #tpu.memory_space<vmem>>, vector<1x8x8xf32>
    %279 = vector.shape_cast %278 : vector<1x8x8xf32> to vector<8x8xf32>
    %cst_164 = arith.constant dense<0.000000e+00> : vector<8x256xf32>
    %280 = tpu.matmul %279, %277, %cst_164 {dimension_numbers = #tpu.dot_dimension_numbers<[1], [0], [0], [1], [0, 0, 1, 1], [], []>} : vector<8x8xf32>, vector<8x256xf32>, vector<8x256xf32> -> vector<8x256xf32>
    %281 = arith.addf %274, %280 : vector<8x256xf32>
    %c17_i32_165 = arith.constant 17 : i32
    %282 = tpu.dynamic_rotate %222 by %c17_i32_165 dim 1 : vector<8x256xf32>, i32 -> vector<8x256xf32>
    %283 = vector.broadcast %12 : vector<1x256xf32> to vector<8x256xf32>
    %284 = arith.mulf %282, %283 : vector<8x256xf32>
    %c0_166 = arith.constant 0 : index
    %c0_167 = arith.constant 0 : index
    %c0_168 = arith.constant 0 : index
    %285 = vector.load %arg3[%c0_166, %c0_167, %c0_168] : memref<9x8x8xf32, #tpu.memory_space<vmem>>, vector<1x8x8xf32>
    %286 = vector.shape_cast %285 : vector<1x8x8xf32> to vector<8x8xf32>
    %cst_169 = arith.constant dense<0.000000e+00> : vector<8x256xf32>
    %287 = tpu.matmul %286, %284, %cst_169 {dimension_numbers = #tpu.dot_dimension_numbers<[1], [0], [0], [1], [0, 0, 1, 1], [], []>} : vector<8x8xf32>, vector<8x256xf32>, vector<8x256xf32> -> vector<8x256xf32>
    %c16_i32_170 = arith.constant 16 : i32
    %288 = tpu.dynamic_rotate %222 by %c16_i32_170 dim 1 : vector<8x256xf32>, i32 -> vector<8x256xf32>
    %289 = vector.broadcast %17 : vector<1x256xf32> to vector<8x256xf32>
    %290 = arith.mulf %288, %289 : vector<8x256xf32>
    %c1_171 = arith.constant 1 : index
    %c0_172 = arith.constant 0 : index
    %c0_173 = arith.constant 0 : index
    %291 = vector.load %arg3[%c1_171, %c0_172, %c0_173] : memref<9x8x8xf32, #tpu.memory_space<vmem>>, vector<1x8x8xf32>
    %292 = vector.shape_cast %291 : vector<1x8x8xf32> to vector<8x8xf32>
    %cst_174 = arith.constant dense<0.000000e+00> : vector<8x256xf32>
    %293 = tpu.matmul %292, %290, %cst_174 {dimension_numbers = #tpu.dot_dimension_numbers<[1], [0], [0], [1], [0, 0, 1, 1], [], []>} : vector<8x8xf32>, vector<8x256xf32>, vector<8x256xf32> -> vector<8x256xf32>
    %294 = arith.addf %287, %293 : vector<8x256xf32>
    %c15_i32_175 = arith.constant 15 : i32
    %295 = tpu.dynamic_rotate %222 by %c15_i32_175 dim 1 : vector<8x256xf32>, i32 -> vector<8x256xf32>
    %296 = vector.broadcast %25 : vector<1x256xf32> to vector<8x256xf32>
    %297 = arith.mulf %295, %296 : vector<8x256xf32>
    %c2_176 = arith.constant 2 : index
    %c0_177 = arith.constant 0 : index
    %c0_178 = arith.constant 0 : index
    %298 = vector.load %arg3[%c2_176, %c0_177, %c0_178] : memref<9x8x8xf32, #tpu.memory_space<vmem>>, vector<1x8x8xf32>
    %299 = vector.shape_cast %298 : vector<1x8x8xf32> to vector<8x8xf32>
    %cst_179 = arith.constant dense<0.000000e+00> : vector<8x256xf32>
    %300 = tpu.matmul %299, %297, %cst_179 {dimension_numbers = #tpu.dot_dimension_numbers<[1], [0], [0], [1], [0, 0, 1, 1], [], []>} : vector<8x8xf32>, vector<8x256xf32>, vector<8x256xf32> -> vector<8x256xf32>
    %301 = arith.addf %294, %300 : vector<8x256xf32>
    %c1_i32_180 = arith.constant 1 : i32
    %302 = tpu.dynamic_rotate %222 by %c1_i32_180 dim 1 : vector<8x256xf32>, i32 -> vector<8x256xf32>
    %303 = vector.broadcast %30 : vector<1x256xf32> to vector<8x256xf32>
    %304 = arith.mulf %302, %303 : vector<8x256xf32>
    %c3_181 = arith.constant 3 : index
    %c0_182 = arith.constant 0 : index
    %c0_183 = arith.constant 0 : index
    %305 = vector.load %arg3[%c3_181, %c0_182, %c0_183] : memref<9x8x8xf32, #tpu.memory_space<vmem>>, vector<1x8x8xf32>
    %306 = vector.shape_cast %305 : vector<1x8x8xf32> to vector<8x8xf32>
    %cst_184 = arith.constant dense<0.000000e+00> : vector<8x256xf32>
    %307 = tpu.matmul %306, %304, %cst_184 {dimension_numbers = #tpu.dot_dimension_numbers<[1], [0], [0], [1], [0, 0, 1, 1], [], []>} : vector<8x8xf32>, vector<8x256xf32>, vector<8x256xf32> -> vector<8x256xf32>
    %308 = arith.addf %301, %307 : vector<8x256xf32>
    %c4_185 = arith.constant 4 : index
    %c0_186 = arith.constant 0 : index
    %c0_187 = arith.constant 0 : index
    %309 = vector.load %arg3[%c4_185, %c0_186, %c0_187] : memref<9x8x8xf32, #tpu.memory_space<vmem>>, vector<1x8x8xf32>
    %310 = vector.shape_cast %309 : vector<1x8x8xf32> to vector<8x8xf32>
    %cst_188 = arith.constant dense<0.000000e+00> : vector<8x256xf32>
    %311 = tpu.matmul %310, %222, %cst_188 {dimension_numbers = #tpu.dot_dimension_numbers<[1], [0], [0], [1], [0, 0, 1, 1], [], []>} : vector<8x8xf32>, vector<8x256xf32>, vector<8x256xf32> -> vector<8x256xf32>
    %312 = arith.addf %308, %311 : vector<8x256xf32>
    %c255_i32_189 = arith.constant 255 : i32
    %313 = tpu.dynamic_rotate %222 by %c255_i32_189 dim 1 : vector<8x256xf32>, i32 -> vector<8x256xf32>
    %314 = vector.broadcast %35 : vector<1x256xf32> to vector<8x256xf32>
    %315 = arith.mulf %313, %314 : vector<8x256xf32>
    %c5_190 = arith.constant 5 : index
    %c0_191 = arith.constant 0 : index
    %c0_192 = arith.constant 0 : index
    %316 = vector.load %arg3[%c5_190, %c0_191, %c0_192] : memref<9x8x8xf32, #tpu.memory_space<vmem>>, vector<1x8x8xf32>
    %317 = vector.shape_cast %316 : vector<1x8x8xf32> to vector<8x8xf32>
    %cst_193 = arith.constant dense<0.000000e+00> : vector<8x256xf32>
    %318 = tpu.matmul %317, %315, %cst_193 {dimension_numbers = #tpu.dot_dimension_numbers<[1], [0], [0], [1], [0, 0, 1, 1], [], []>} : vector<8x8xf32>, vector<8x256xf32>, vector<8x256xf32> -> vector<8x256xf32>
    %319 = arith.addf %312, %318 : vector<8x256xf32>
    %c241_i32_194 = arith.constant 241 : i32
    %320 = tpu.dynamic_rotate %222 by %c241_i32_194 dim 1 : vector<8x256xf32>, i32 -> vector<8x256xf32>
    %321 = vector.broadcast %43 : vector<1x256xf32> to vector<8x256xf32>
    %322 = arith.mulf %320, %321 : vector<8x256xf32>
    %c6_195 = arith.constant 6 : index
    %c0_196 = arith.constant 0 : index
    %c0_197 = arith.constant 0 : index
    %323 = vector.load %arg3[%c6_195, %c0_196, %c0_197] : memref<9x8x8xf32, #tpu.memory_space<vmem>>, vector<1x8x8xf32>
    %324 = vector.shape_cast %323 : vector<1x8x8xf32> to vector<8x8xf32>
    %cst_198 = arith.constant dense<0.000000e+00> : vector<8x256xf32>
    %325 = tpu.matmul %324, %322, %cst_198 {dimension_numbers = #tpu.dot_dimension_numbers<[1], [0], [0], [1], [0, 0, 1, 1], [], []>} : vector<8x8xf32>, vector<8x256xf32>, vector<8x256xf32> -> vector<8x256xf32>
    %326 = arith.addf %319, %325 : vector<8x256xf32>
    %c240_i32_199 = arith.constant 240 : i32
    %327 = tpu.dynamic_rotate %222 by %c240_i32_199 dim 1 : vector<8x256xf32>, i32 -> vector<8x256xf32>
    %328 = vector.broadcast %48 : vector<1x256xf32> to vector<8x256xf32>
    %329 = arith.mulf %327, %328 : vector<8x256xf32>
    %c7_200 = arith.constant 7 : index
    %c0_201 = arith.constant 0 : index
    %c0_202 = arith.constant 0 : index
    %330 = vector.load %arg3[%c7_200, %c0_201, %c0_202] : memref<9x8x8xf32, #tpu.memory_space<vmem>>, vector<1x8x8xf32>
    %331 = vector.shape_cast %330 : vector<1x8x8xf32> to vector<8x8xf32>
    %cst_203 = arith.constant dense<0.000000e+00> : vector<8x256xf32>
    %332 = tpu.matmul %331, %329, %cst_203 {dimension_numbers = #tpu.dot_dimension_numbers<[1], [0], [0], [1], [0, 0, 1, 1], [], []>} : vector<8x8xf32>, vector<8x256xf32>, vector<8x256xf32> -> vector<8x256xf32>
    %333 = arith.addf %326, %332 : vector<8x256xf32>
    %c239_i32_204 = arith.constant 239 : i32
    %334 = tpu.dynamic_rotate %222 by %c239_i32_204 dim 1 : vector<8x256xf32>, i32 -> vector<8x256xf32>
    %335 = vector.broadcast %56 : vector<1x256xf32> to vector<8x256xf32>
    %336 = arith.mulf %334, %335 : vector<8x256xf32>
    %c8_205 = arith.constant 8 : index
    %c0_206 = arith.constant 0 : index
    %c0_207 = arith.constant 0 : index
    %337 = vector.load %arg3[%c8_205, %c0_206, %c0_207] : memref<9x8x8xf32, #tpu.memory_space<vmem>>, vector<1x8x8xf32>
    %338 = vector.shape_cast %337 : vector<1x8x8xf32> to vector<8x8xf32>
    %cst_208 = arith.constant dense<0.000000e+00> : vector<8x256xf32>
    %339 = tpu.matmul %338, %336, %cst_208 {dimension_numbers = #tpu.dot_dimension_numbers<[1], [0], [0], [1], [0, 0, 1, 1], [], []>} : vector<8x8xf32>, vector<8x256xf32>, vector<8x256xf32> -> vector<8x256xf32>
    %340 = arith.addf %333, %339 : vector<8x256xf32>
    %c2_209 = arith.constant 2 : index
    %c0_210 = arith.constant 0 : index
    %c0_211 = arith.constant 0 : index
    %341 = vector.load %arg4[%c2_209, %c0_210, %c0_211] : memref<4x8x1xf32, #tpu.memory_space<vmem>>, vector<1x8x1xf32>
    %342 = vector.shape_cast %341 : vector<1x8x1xf32> to vector<8x1xf32>
    %c3_212 = arith.constant 3 : index
    %c0_213 = arith.constant 0 : index
    %c0_214 = arith.constant 0 : index
    %343 = vector.load %arg4[%c3_212, %c0_213, %c0_214] : memref<4x8x1xf32, #tpu.memory_space<vmem>>, vector<1x8x1xf32>
    %344 = vector.shape_cast %343 : vector<1x8x1xf32> to vector<8x1xf32>
    %cst_215 = arith.constant dense<0.000000e+00> : vector<8xf32>
    %345 = vector.multi_reduction <add>, %281, %cst_215 [1] : vector<8x256xf32> to vector<8xf32>
    %346 = vector.shape_cast %345 : vector<8xf32> to vector<8x1xf32>
    %cst_216 = arith.constant 0.000000e+00 : f32
    %347 = vector.broadcast %cst_216 : f32 to vector<8x1xf32>
    %348 = arith.addf %347, %346 : vector<8x1xf32>
    %cst_217 = arith.constant dense<0.000000e+00> : vector<8xf32>
    %349 = vector.multi_reduction <add>, %340, %cst_217 [1] : vector<8x256xf32> to vector<8xf32>
    %350 = vector.shape_cast %349 : vector<8xf32> to vector<8x1xf32>
    %351 = arith.addf %348, %350 : vector<8x1xf32>
    %352 = arith.mulf %281, %281 : vector<8x256xf32>
    %cst_218 = arith.constant dense<0.000000e+00> : vector<8xf32>
    %353 = vector.multi_reduction <add>, %352, %cst_218 [1] : vector<8x256xf32> to vector<8xf32>
    %354 = vector.shape_cast %353 : vector<8xf32> to vector<8x1xf32>
    %cst_219 = arith.constant 0.000000e+00 : f32
    %355 = vector.broadcast %cst_219 : f32 to vector<8x1xf32>
    %356 = arith.addf %355, %354 : vector<8x1xf32>
    %357 = arith.mulf %340, %340 : vector<8x256xf32>
    %cst_220 = arith.constant dense<0.000000e+00> : vector<8xf32>
    %358 = vector.multi_reduction <add>, %357, %cst_220 [1] : vector<8x256xf32> to vector<8xf32>
    %359 = vector.shape_cast %358 : vector<8xf32> to vector<8x1xf32>
    %360 = arith.addf %356, %359 : vector<8x1xf32>
    %cst_221 = arith.constant 0.001953125 : f32
    %361 = vector.broadcast %cst_221 : f32 to vector<8x1xf32>
    %362 = arith.mulf %351, %361 : vector<8x1xf32>
    %cst_222 = arith.constant 0.001953125 : f32
    %363 = vector.broadcast %cst_222 : f32 to vector<8x1xf32>
    %364 = arith.mulf %360, %363 : vector<8x1xf32>
    %365 = arith.mulf %362, %362 : vector<8x1xf32>
    %366 = arith.subf %364, %365 : vector<8x1xf32>
    %cst_223 = arith.constant 9.99999974E-6 : f32
    %367 = vector.broadcast %cst_223 : f32 to vector<8x1xf32>
    %368 = arith.addf %366, %367 : vector<8x1xf32>
    %369 = math.rsqrt %368 : vector<8x1xf32>
    %370 = arith.mulf %342, %369 : vector<8x1xf32>
    %371 = arith.mulf %362, %370 : vector<8x1xf32>
    %372 = arith.subf %344, %371 : vector<8x1xf32>
    %373 = vector.broadcast %370 : vector<8x1xf32> to vector<8x256xf32>
    %374 = arith.mulf %281, %373 : vector<8x256xf32>
    %375 = vector.broadcast %372 : vector<8x1xf32> to vector<8x256xf32>
    %376 = arith.addf %374, %375 : vector<8x256xf32>
    %cst_224 = arith.constant 0.000000e+00 : f32
    %377 = vector.broadcast %cst_224 : f32 to vector<8x256xf32>
    %378 = arith.maximumf %376, %377 : vector<8x256xf32>
    %379 = vector.broadcast %370 : vector<8x1xf32> to vector<8x256xf32>
    %380 = arith.mulf %340, %379 : vector<8x256xf32>
    %381 = vector.broadcast %372 : vector<8x1xf32> to vector<8x256xf32>
    %382 = arith.addf %380, %381 : vector<8x256xf32>
    %cst_225 = arith.constant 0.000000e+00 : f32
    %383 = vector.broadcast %cst_225 : f32 to vector<8x256xf32>
    %384 = arith.maximumf %382, %383 : vector<8x256xf32>
    %c0_226 = arith.constant 0 : index
    %c0_227 = arith.constant 0 : index
    %c0_228 = arith.constant 0 : index
    %385 = vector.load %arg5[%c0_226, %c0_227, %c0_228] : memref<2x8x256xf32, #tpu.memory_space<vmem>>, vector<1x8x256xf32>
    %386 = vector.shape_cast %385 : vector<1x8x256xf32> to vector<8x256xf32>
    %387 = vector.shape_cast %378 : vector<8x256xf32> to vector<1x8x256xf32>
    tpu.vector_store %arg5[%c0_226, %c0_227, %c0_228], %387 {strides = array<i32>} : memref<2x8x256xf32, #tpu.memory_space<vmem>>, vector<1x8x256xf32>,
    %c1_229 = arith.constant 1 : index
    %c0_230 = arith.constant 0 : index
    %c0_231 = arith.constant 0 : index
    %388 = vector.load %arg5[%c1_229, %c0_230, %c0_231] : memref<2x8x256xf32, #tpu.memory_space<vmem>>, vector<1x8x256xf32>
    %389 = vector.shape_cast %388 : vector<1x8x256xf32> to vector<8x256xf32>
    %390 = vector.shape_cast %384 : vector<8x256xf32> to vector<1x8x256xf32>
    tpu.vector_store %arg5[%c1_229, %c0_230, %c0_231], %390 {strides = array<i32>} : memref<2x8x256xf32, #tpu.memory_space<vmem>>, vector<1x8x256xf32>,
    return
  }
  func.func @transform_0(%arg0: i32) -> (i32, i32, i32) {
    %c0_i32 = arith.constant 0 : i32
    %c0_i32_0 = arith.constant 0 : i32
    %c0_i32_1 = arith.constant 0 : i32
    %c0_i32_2 = arith.constant 0 : i32
    return %c0_i32, %c0_i32_0, %c0_i32_1 : i32, i32, i32
  }
  func.func @transform_1(%arg0: i32) -> (i32, i32, i32) {
    %c0_i32 = arith.constant 0 : i32
    %c0_i32_0 = arith.constant 0 : i32
    %c0_i32_1 = arith.constant 0 : i32
    %c0_i32_2 = arith.constant 0 : i32
    return %c0_i32, %c0_i32_0, %c0_i32_1 : i32, i32, i32
  }
  func.func @transform_2(%arg0: i32) -> (i32, i32, i32) {
    %c0_i32 = arith.constant 0 : i32
    %c0_i32_0 = arith.constant 0 : i32
    %c0_i32_1 = arith.constant 0 : i32
    %c0_i32_2 = arith.constant 0 : i32
    return %c0_i32, %c0_i32_0, %c0_i32_1 : i32, i32, i32
  }
  func.func @transform_3(%arg0: i32) -> (i32, i32, i32) {
    %c0_i32 = arith.constant 0 : i32
    %c0_i32_0 = arith.constant 0 : i32
    %c0_i32_1 = arith.constant 0 : i32
    %c0_i32_2 = arith.constant 0 : i32
    return %c0_i32, %c0_i32_0, %c0_i32_1 : i32, i32, i32
  }
  func.func @transform_4(%arg0: i32) -> (i32, i32, i32) {
    %c0_i32 = arith.constant 0 : i32
    %c0_i32_0 = arith.constant 0 : i32
    %c0_i32_1 = arith.constant 0 : i32
    %c0_i32_2 = arith.constant 0 : i32
    return %c0_i32, %c0_i32_0, %c0_i32_1 : i32, i32, i32
  }
}

</mosaic_0001>

<bundles_post_ra>
// kernel: double_conv_forward.1
= control target key start
LH: loop header
LB: loop body
LE: loop exit
PB: predicated region body
PF: predicated region fallthrough
CT: control target
= control target key end

     0   :  { %v3430_v2 = vmov 0.0   ;;  %s3431_s19 = smov 16   ;;  %s3433_s20 = smov 15   ;;  %v17_v5 = vlaneseq  ;;  %vm87_vm6 = vcmask 1043456   ;;  %vm83_vm9 = vcmask 31744   ;;  %s4158_s0 = inlined_call_operand.vmem [shape: f32[2,4,256], index: 0, kind: input, shape index: {}]   ;;  %s4159_s1 = inlined_call_operand.vmem [shape: f32[9,8,4], index: 1, kind: input, shape index: {}]   ;;  %s4160_s3 = inlined_call_operand.vmem [shape: f32[4,8,1], index: 3, kind: input, shape index: {}]   ;;  %s4161_s2 = inlined_call_operand.vmem [shape: f32[9,8,8], index: 2, kind: input, shape index: {}]   ;;  %s4162_s4 = inlined_call_operand.vmem [shape: f32[2,8,256], index: 4, kind: output, shape index: {}]  }
   0x1   :  { %v3468_v0 = vld [vmem:[%s4158_s0 + $0x8] sm:$0xff]  ;;  %v3473_v1 = vld [vmem:[%s4158_s0] sm:$0xff]  ;;  %158 = vmatprep.mubr.f32.mxu0 %v3430_v2  ;;  %974 = vmatprep.mubr.f32.mxu1 %v3430_v2  ;;  %s3432_s0 = smov 17   ;;  %s3434_s21 = smov 1   ;;  %v3278_v38 = vld [vmem:[%s4159_s1 + $0x30] sm:$0xff] }
   0x2   :  { %896 = vrot.lane.b32.xlu1 %v3468_v0, %s3431_s19  ;;  %72 = vrot.lane.b32.xlu0 %v3473_v1, %s3431_s19  ;;  %v3483_v3 = vcombine.high %v3468_v0, %v3468_v0  ;;  %v3487_v4 = vcombine.high %v3473_v1, %v3473_v1  ;;  %s3435_s22 = smov 127   ;;  %s3436_s23 = smov 113   ;;  %v3549_v6 = vand.u32 127, %v17_v5  ;;  %v3255_v32 = vld [vmem:[%s4159_s1 + $0x8] sm:$0xff]  ;;  %v71_v49 = vld [vmem:[%s4159_s1] sm:$0xff] }
   0x3   :  { %s3437_s24 = smov 112   ;;  %s3438_s25 = smov 111   ;;  %v3262_v5 = vld [vmem:[%s4159_s1 + $0x10] sm:$0xff] }
   0x4   :  { %v3552_v7 = vadd.s32 128, %v3549_v6  ;;  %v22_v8 = vshra.s32 %v3549_v6, 4  ;;  %v20_v10 = vand.u32 15, %v3549_v6  ;;  %vm76_vm4 = vcmp.lt.s32.totalorder %v3549_v6, 16 }
   0x5   :  { %vm66_vm8 = vcmp.lt.s32.totalorder %v3549_v6, 17  ;;  %vm249_vm14 = vcmp.lt.s32.totalorder %v3549_v6, 15  ;;  %vm342_vm15 = vcmp.lt.s32.totalorder %v3549_v6, 1 }
   0x6   :  { %898 = vrot.lane.b32.xlu1 %v3483_v3, %s3431_s19  ;;  %74 = vrot.lane.b32.xlu0 %v3487_v4, %s3431_s19  ;;  %v23_v9 = vshra.s32 %v3552_v7, 4  ;;  %v21_v11 = vand.u32 15, %v3552_v7  ;;  %vm3560_vm0 = vcmp.ge.s32.totalorder %v22_v8, 1  ;;  %vm3570_vm2 = vcmp.ge.s32.totalorder %v20_v10, 1 }
   0x7   :  { %v3582_v18 = vsel %vm3560_vm0, 1.0, %v3430_v2  ;;  %vm28_vm5 = vmand %vm3560_vm0, %vm3570_vm2  ;;  %vm3621_vm10 = vcmp.le.s32.totalorder %v20_v10, 14  ;;  %v3691_v62 = vsel %vm3570_vm2, 1.0, %v3430_v2 }
   0x8   :  { %vm3566_vm1 = vcmp.ge.s32.totalorder %v23_v9, 1  ;;  %vm3574_vm3 = vcmp.ge.s32.totalorder %v21_v11, 1  ;;  %v3611_v30 = vsel %vm28_vm5, 1.0, %v3430_v2  ;;  %vm3631_vm11 = vcmp.le.s32.totalorder %v21_v11, 14  ;;  %vm36_vm12 = vmand %vm3560_vm0, %vm3621_vm10 }
   0x9   :  { %v3587_v19 = vsel %vm3566_vm1, 1.0, %v3430_v2  ;;  %vm29_vm7 = vmand %vm3566_vm1, %vm3574_vm3  ;;  %v3659_v47 = vsel %vm36_vm12, 1.0, %v3430_v2  ;;  %v3696_v63 = vsel %vm3574_vm3, 1.0, %v3430_v2  ;;  %vm517_vm0 = vcmp.lt.s32.totalorder %v3549_v6, 127 }
   0xa   :  { %64 = vrot.lane.b32.xlu1 %v3487_v4, %s3432_s0  ;;  %62 = vrot.lane.b32.xlu0 %v3473_v1, %s3432_s0  ;;  %v3614_v31 = vsel %vm29_vm7, 1.0, %v3430_v2  ;;  %vm37_vm13 = vmand %vm3566_vm1, %vm3631_vm11  ;;  %vm3738_vm1 = vcmp.le.s32.totalorder %v23_v9, 14  ;;  %v3752_v7 = vsel %vm3621_vm10, 1.0, %v3430_v2  ;;  %vm3772_vm7 = vcmp.le.s32.totalorder %v22_v8, 14 }
   0xb   :  { %v3662_v48 = vsel %vm37_vm13, 1.0, %v3430_v2  ;;  %vm47_vm5 = vmand %vm3738_vm1, %vm3574_vm3  ;;  %vm610_vm3 = vcmp.lt.s32.totalorder %v3549_v6, 113 }
   0xc   :  { %vm46_vm12 = vmand %vm3772_vm7, %vm3570_vm2  ;;  %vm703_vm2 = vcmp.lt.s32.totalorder %v3549_v6, 112 }
   0xd   :  { %vm53_vm13 = vmand %vm3738_vm1, %vm3631_vm11 }
   0xe   :  { %890 = vrot.lane.b32.xlu1 %v3483_v3, %s3432_s0  ;;  %888 = vrot.lane.b32.xlu0 %v3468_v0, %s3432_s0 }
  0x12   :  { %247 = vrot.lane.b32.xlu1 %v3487_v4, %s3433_s20  ;;  %245 = vrot.lane.b32.xlu0 %v3473_v1, %s3433_s20 }
  0x16   :  { %1060 = vrot.lane.b32.xlu1 %v3483_v3, %s3433_s20  ;;  %1058 = vrot.lane.b32.xlu0 %v3468_v0, %s3433_s20 }
  0x1a   :  { %340 = vrot.lane.b32.xlu1 %v3487_v4, %s3434_s21  ;;  %338 = vrot.lane.b32.xlu0 %v3473_v1, %s3434_s21 }
  0x1e   :  { %1147 = vrot.lane.b32.xlu1 %v3483_v3, %s3434_s21  ;;  %1145 = vrot.lane.b32.xlu0 %v3468_v0, %s3434_s21 }
  0x22   :  { %515 = vrot.lane.b32.xlu1 %v3487_v4, %s3435_s22  ;;  %513 = vrot.lane.b32.xlu0 %v3473_v1, %s3435_s22 }
  0x26   :  { %1311 = vrot.lane.b32.xlu1 %v3483_v3, %s3435_s22  ;;  %1309 = vrot.lane.b32.xlu0 %v3468_v0, %s3435_s22 }
  0x2a   :  { %608 = vrot.lane.b32.xlu1 %v3487_v4, %s3436_s23  ;;  %606 = vrot.lane.b32.xlu0 %v3473_v1, %s3436_s23 }
  0x2e   :  { %1398 = vrot.lane.b32.xlu1 %v3483_v3, %s3436_s23  ;;  %1396 = vrot.lane.b32.xlu0 %v3468_v0, %s3436_s23 }
  0x32   :  { %701 = vrot.lane.b32.xlu1 %v3487_v4, %s3437_s24  ;;  %699 = vrot.lane.b32.xlu0 %v3473_v1, %s3437_s24 }
  0x36   :  { %1485 = vrot.lane.b32.xlu1 %v3483_v3, %s3437_s24  ;;  %1483 = vrot.lane.b32.xlu0 %v3468_v0, %s3437_s24 }
  0x3a   :  { %794 = vrot.lane.b32.xlu1 %v3487_v4, %s3438_s25  ;;  %792 = vrot.lane.b32.xlu0 %v3473_v1, %s3438_s25 }
  0x3e   :  { %1572 = vrot.lane.b32.xlu1 %v3483_v3, %s3438_s25  ;;  %1570 = vrot.lane.b32.xlu0 %v3468_v0, %s3438_s25 }
  0x74   :  { %v897_v12 = vpop.permute.xlu1 %896  ;;  %v73_v13 = vpop.permute.xlu0 %72 }
  0x78   :  { %v899_v20 = vpop.permute.xlu1 %898  ;;  %v75_v21 = vpop.permute.xlu0 %74 }
  0x79   :  { %v900_v22 = vsel %vm76_vm4, %v897_v12, %v899_v20  ;;  %v901_v23 = vsel %vm76_vm4, %v899_v20, %v897_v12  ;;  %v77_v24 = vsel %vm76_vm4, %v73_v13, %v75_v21  ;;  %v78_v25 = vsel %vm76_vm4, %v75_v21, %v73_v13 }
  0x7a   :  { %v902_v26 = vmul.f32 %v901_v23, %v3582_v18  ;;  %v79_v27 = vmul.f32 %v78_v25, %v3582_v18  ;;  %v903_v28 = vmul.f32 %v900_v22, %v3587_v19  ;;  %v80_v29 = vmul.f32 %v77_v24, %v3587_v19 }
  0x7c   :  { %3290 = vmatprep.subr.msk.mxu1 %vm87_vm6, %v903_v28  ;;  %v65_v33 = vpop.permute.xlu1 %64  ;;  %3256 = vmatprep.subr.msk.mxu0 %vm87_vm6, %v80_v29  ;;  %v63_v34 = vpop.permute.xlu0 %62 }
  0x7d   :  { %v67_v36 = vsel %vm66_vm8, %v63_v34, %v65_v33  ;;  %v68_v37 = vsel %vm66_vm8, %v65_v33, %v63_v34  ;;  %3257 = vmatpush1.msk.msra.mxu0 %vm87_vm6, %v79_v27  ;;  %3291 = vmatpush1.msk.msra.mxu1 %vm87_vm6, %v902_v26  ;;  %v3266_v26 = vld [vmem:[%s4159_s1 + $0x18] sm:$0xff]  ;;  %v3730_v27 = vsel %vm3631_vm11, 1.0, %v3430_v2  ;;  %vm52_vm11 = vmand %vm3772_vm7, %vm3621_vm10 }
  0x7e   :  { %v69_v39 = vmul.f32 %v68_v37, %v3611_v30  ;;  %v70_v40 = vmul.f32 %v67_v36, %v3614_v31  ;;  %3258 = vmatmul.mubr.msk.f32.vlgmr.msra.gmra.mrb[0].mxu0 %vm83_vm9, %v3255_v32  ;;  %3292 = vmatmul.mubr.msk.f32.vlgmr.msra.gmra.mrb[0].mxu1 %vm83_vm9, %v3255_v32 }
  0x7f   :  { %238 = vmatprep.mubr.f32.mxu0 %v3430_v2  ;;  %1051 = vmatprep.mubr.f32.mxu1 %v3430_v2 }
  0x80   :  { %v891_v41 = vpop.permute.xlu1 %890  ;;  %v889_v42 = vpop.permute.xlu0 %888  ;;  %3259 = vmatprep.subr.msk.mxu0 %vm87_vm6, %v70_v40  ;;  %v3782_v40 = vsel %vm47_vm5, 1.0, %v3430_v2  ;;  %vm796_vm5 = vcmp.lt.s32.totalorder %v3549_v6, 111 }
  0x81   :  { %v892_v43 = vsel %vm66_vm8, %v889_v42, %v891_v41  ;;  %v893_v44 = vsel %vm66_vm8, %v891_v41, %v889_v42  ;;  %3260 = vmatpush1.msk.msra.mxu0 %vm87_vm6, %v69_v39  ;;  %v3270_v39 = vld [vmem:[%s4159_s1 + $0x20] sm:$0xff] }
  0x82   :  { %v894_v45 = vmul.f32 %v893_v44, %v3611_v30  ;;  %v895_v46 = vmul.f32 %v892_v43, %v3614_v31 }
  0x84   :  { %v248_v50 = vpop.permute.xlu1 %247  ;;  %3293 = vmatprep.subr.msk.mxu1 %vm87_vm6, %v895_v46  ;;  %v246_v51 = vpop.permute.xlu0 %245 }
  0x85   :  { %v250_v52 = vsel %vm249_vm14, %v246_v51, %v248_v50  ;;  %v251_v53 = vsel %vm249_vm14, %v248_v50, %v246_v51  ;;  %3294 = vmatpush1.msk.msra.mxu1 %vm87_vm6, %v894_v45  ;;  %v3798_v45 = vsel %vm46_vm12, 1.0, %v3430_v2 }
  0x86   :  { %v252_v54 = vmul.f32 %v251_v53, %v3659_v47  ;;  %v253_v55 = vmul.f32 %v250_v52, %v3662_v48  ;;  %3261 = vmatmul.mubr.msk.f32.vlgmr.msra.gmra.mrb[0].mxu0 %vm83_vm9, %v71_v49  ;;  %3295 = vmatmul.mubr.msk.f32.vlgmr.msra.gmra.mrb[0].mxu1 %vm83_vm9, %v71_v49 }
  0x87   :  { %329 = vmatprep.mubr.f32.mxu0 %v3430_v2  ;;  %1136 = vmatprep.mubr.f32.mxu1 %v3430_v2 }
  0x88   :  { %v1061_v56 = vpop.permute.xlu1 %1060  ;;  %v1059_v57 = vpop.permute.xlu0 %1058  ;;  %3263 = vmatprep.subr.msk.mxu0 %vm87_vm6, %v253_v55  ;;  %v3818_v55 = vsel %vm3738_vm1, 1.0, %v3430_v2 }
  0x89   :  { %v1062_v58 = vsel %vm249_vm14, %v1059_v57, %v1061_v56  ;;  %v1063_v59 = vsel %vm249_vm14, %v1061_v56, %v1059_v57  ;;  %3264 = vmatpush1.msk.msra.mxu0 %vm87_vm6, %v252_v54  ;;  %v3274_v54 = vld [vmem:[%s4159_s1 + $0x28] sm:$0xff] }
  0x8a   :  { %v1064_v60 = vmul.f32 %v1063_v59, %v3659_v47  ;;  %v1065_v61 = vmul.f32 %v1062_v58, %v3662_v48 }
  0x8c   :  { %v341_v10 = vpop.permute.xlu1 %340  ;;  %3296 = vmatprep.subr.msk.mxu1 %vm87_vm6, %v1065_v61  ;;  %v339_v11 = vpop.permute.xlu0 %338  ;;  %v3832_v61 = vsel %vm3772_vm7, 1.0, %v3430_v2 }
  0x8d   :  { %v343_v12 = vsel %vm342_vm15, %v339_v11, %v341_v10  ;;  %v344_v13 = vsel %vm342_vm15, %v341_v10, %v339_v11  ;;  %3297 = vmatpush1.msk.msra.mxu1 %vm87_vm6, %v1064_v60 }
  0x8e   :  { %v345_v14 = vmul.f32 %v344_v13, %v3691_v62  ;;  %v346_v15 = vmul.f32 %v343_v12, %v3696_v63  ;;  %3265 = vmatmul.mubr.msk.f32.vlgmr.msra.gmra.mrb[0].mxu0 %vm83_vm9, %v3262_v5  ;;  %3298 = vmatmul.mubr.msk.f32.vlgmr.msra.gmra.mrb[0].mxu1 %vm83_vm9, %v3262_v5 }
  0x8f   :  { %422 = vmatprep.mubr.f32.mxu0 %v3430_v2  ;;  %1223 = vmatprep.mubr.f32.mxu1 %v3430_v2 }
  0x90   :  { %v1148_v20 = vpop.permute.xlu1 %1147  ;;  %v1146_v21 = vpop.permute.xlu0 %1145  ;;  %3267 = vmatprep.subr.msk.mxu0 %vm87_vm6, %v346_v15 }
  0x91   :  { %v1149_v22 = vsel %vm342_vm15, %v1146_v21, %v1148_v20  ;;  %v1150_v23 = vsel %vm342_vm15, %v1148_v20, %v1146_v21  ;;  %3268 = vmatpush1.msk.msra.mxu0 %vm87_vm6, %v345_v14  ;;  %v3854_v20 = vsel %vm53_vm13, 1.0, %v3430_v2 }
  0x92   :  { %v1151_v24 = vmul.f32 %v1150_v23, %v3691_v62  ;;  %v1152_v25 = vmul.f32 %v1149_v22, %v3696_v63  ;;  %3271 = vmatprep.subr.msk.mxu0 %vm87_vm6, %v3487_v4 }
  0x94   :  { %3299 = vmatprep.subr.msk.mxu1 %vm87_vm6, %v1152_v25  ;;  %v516_v28 = vpop.permute.xlu1 %515  ;;  %v514_v29 = vpop.permute.xlu0 %513 }
  0x95   :  { %3300 = vmatpush1.msk.msra.mxu1 %vm87_vm6, %v1151_v24  ;;  %v519_v4 = vsel %vm517_vm0, %v516_v28, %v514_v29  ;;  %v518_v9 = vsel %vm517_vm0, %v514_v29, %v516_v28 }
  0x96   :  { %3269 = vmatmul.mubr.msk.f32.vlgmr.msra.gmra.mrb[0].mxu0 %vm83_vm9, %v3266_v26  ;;  %3301 = vmatmul.mubr.msk.f32.vlgmr.msra.gmra.mrb[0].mxu1 %vm83_vm9, %v3266_v26  ;;  %v521_v33 = vmul.f32 %v519_v4, %v3730_v27  ;;  %v520_v17 = vmul.f32 %v518_v9, %v3752_v7  ;;  %v3870_v26 = vsel %vm52_vm11, 1.0, %v3430_v2 }
  0x97   :  { %3302 = vmatprep.subr.msk.mxu1 %vm87_vm6, %v3483_v3  ;;  %3272 = vmatpush1.msk.msra.mxu0 %vm87_vm6, %v3473_v1 }
  0x98   :  { %504 = vmatprep.mubr.f32.mxu0 %v3430_v2  ;;  %3303 = vmatpush1.msk.msra.mxu1 %vm87_vm6, %v3468_v0  ;;  %v1312_v34 = vpop.permute.xlu1 %1311  ;;  %v1310_v36 = vpop.permute.xlu0 %1309 }
  0x99   :  { %1300 = vmatprep.mubr.f32.mxu1 %v3430_v2  ;;  %v1313_v1 = vsel %vm517_vm0, %v1310_v36, %v1312_v34  ;;  %v1314_v3 = vsel %vm517_vm0, %v1312_v34, %v1310_v36  ;;  %3275 = vmatprep.subr.msk.mxu0 %vm87_vm6, %v521_v33  ;;  %v3282_v34 = vld [vmem:[%s4159_s1 + $0x38] sm:$0xff] }
  0x9a   :  { %v1316_v37 = vmul.f32 %v1314_v3, %v3730_v27  ;;  %v1315_v41 = vmul.f32 %v1313_v1, %v3752_v7  ;;  %v3286_v1 = vld [vmem:[%s4159_s1 + $0x40] sm:$0xff] }
  0x9c   :  { %v609_v42 = vpop.permute.xlu1 %608  ;;  %3305 = vmatprep.subr.msk.mxu1 %vm87_vm6, %v1316_v37  ;;  %v607_v8 = vpop.permute.xlu0 %606 }
  0x9d   :  { %v612_v43 = vsel %vm610_vm3, %v609_v42, %v607_v8  ;;  %v611_v16 = vsel %vm610_vm3, %v607_v8, %v609_v42 }
  0x9e   :  { %3273 = vmatmul.mubr.msk.f32.vlgmr.msra.gmra.mrb[0].mxu0 %vm83_vm9, %v3270_v39  ;;  %3304 = vmatmul.mubr.msk.f32.vlgmr.msra.gmra.mrb[0].mxu1 %vm83_vm9, %v3270_v39  ;;  %v614_v44 = vmul.f32 %v612_v43, %v3782_v40  ;;  %v613_v53 = vmul.f32 %v611_v16, %v3798_v45 }
  0x9f   :  { %3276 = vmatpush1.msk.msra.mxu0 %vm87_vm6, %v520_v17  ;;  %597 = vmatprep.mubr.f32.mxu0 %v3430_v2 }
  0xa0   :  { %3306 = vmatpush1.msk.msra.mxu1 %vm87_vm6, %v1315_v41  ;;  %1387 = vmatprep.mubr.f32.mxu1 %v3430_v2  ;;  %v1399_v46 = vpop.permute.xlu1 %1398  ;;  %v1397_v49 = vpop.permute.xlu0 %1396 }
  0xa1   :  { %v1400_v50 = vsel %vm610_vm3, %v1397_v49, %v1399_v46  ;;  %v1401_v51 = vsel %vm610_vm3, %v1399_v46, %v1397_v49  ;;  %3279 = vmatprep.subr.msk.mxu0 %vm87_vm6, %v614_v44  ;;  %v3439_v49 = vmov 0  }
  0xa2   :  { %v1403_v52 = vmul.f32 %v1401_v51, %v3782_v40  ;;  %v1402_v56 = vmul.f32 %v1400_v50, %v3798_v45  ;;  %3422 = vset.pattern.permute.xlu1 %v3439_v49  ;;  %3423 = vset.pattern.permute.xlu0 %v3439_v49 }
  0xa4   :  { %v702_v57 = vpop.permute.xlu1 %701  ;;  %3308 = vmatprep.subr.msk.mxu1 %vm87_vm6, %v1403_v52  ;;  %v700_v58 = vpop.permute.xlu0 %699 }
  0xa5   :  { %v705_v59 = vsel %vm703_vm2, %v702_v57, %v700_v58  ;;  %v704_v5 = vsel %vm703_vm2, %v700_v58, %v702_v57 }
  0xa6   :  { %3277 = vmatmul.mubr.msk.f32.vlgmr.msra.gmra.mrb[0].mxu0 %vm83_vm9, %v3274_v54  ;;  %3307 = vmatmul.mubr.msk.f32.vlgmr.msra.gmra.mrb[0].mxu1 %vm83_vm9, %v3274_v54  ;;  %v707_v60 = vmul.f32 %v705_v59, %v3818_v55  ;;  %v706_v15 = vmul.f32 %v704_v5, %v3832_v61 }
  0xa7   :  { %3280 = vmatpush1.msk.msra.mxu0 %vm87_vm6, %v613_v53  ;;  %690 = vmatprep.mubr.f32.mxu0 %v3430_v2 }
  0xa8   :  { %3309 = vmatpush1.msk.msra.mxu1 %vm87_vm6, %v1402_v56  ;;  %1474 = vmatprep.mubr.f32.mxu1 %v3430_v2  ;;  %v1486_v10 = vpop.permute.xlu1 %1485  ;;  %v1484_v11 = vpop.permute.xlu0 %1483 }
  0xa9   :  { %v1487_v12 = vsel %vm703_vm2, %v1484_v11, %v1486_v10  ;;  %v1488_v13 = vsel %vm703_vm2, %v1486_v10, %v1484_v11  ;;  %3283 = vmatprep.subr.msk.mxu0 %vm87_vm6, %v707_v60  ;;  %v1657_v10 = vld [vmem:[%s4160_s3] sm:$0xff] }
  0xaa   :  { %v1490_v14 = vmul.f32 %v1488_v13, %v3818_v55  ;;  %v1489_v21 = vmul.f32 %v1487_v12, %v3832_v61  ;;  %v3317_v13 = vld [vmem:[%s4160_s3 + $0x8] sm:$0xff] }
  0xac   :  { %v795_v22 = vpop.permute.xlu1 %794  ;;  %3311 = vmatprep.subr.msk.mxu1 %vm87_vm6, %v1490_v14  ;;  %v793_v23 = vpop.permute.xlu0 %792 }
  0xad   :  { %v798_v24 = vsel %vm796_vm5, %v795_v22, %v793_v23  ;;  %v797_v35 = vsel %vm796_vm5, %v793_v23, %v795_v22 }
  0xae   :  { %3281 = vmatmul.mubr.msk.f32.vlgmr.msra.gmra.mrb[0].mxu0 %vm83_vm9, %v3278_v38  ;;  %3310 = vmatmul.mubr.msk.f32.vlgmr.msra.gmra.mrb[0].mxu1 %vm83_vm9, %v3278_v38  ;;  %v800_v25 = vmul.f32 %v798_v24, %v3854_v20  ;;  %v799_v9 = vmul.f32 %v797_v35, %v3870_v26 }
  0xaf   :  { %3284 = vmatpush1.msk.msra.mxu0 %vm87_vm6, %v706_v15  ;;  %783 = vmatprep.mubr.f32.mxu0 %v3430_v2 }
  0xb0   :  { %3312 = vmatpush1.msk.msra.mxu1 %vm87_vm6, %v1489_v21  ;;  %1561 = vmatprep.mubr.f32.mxu1 %v3430_v2  ;;  %v1573_v28 = vpop.permute.xlu1 %1572  ;;  %v1571_v29 = vpop.permute.xlu0 %1570 }
  0xb1   :  { %v1574_v4 = vsel %vm796_vm5, %v1571_v29, %v1573_v28  ;;  %v1575_v32 = vsel %vm796_vm5, %v1573_v28, %v1571_v29  ;;  %3287 = vmatprep.subr.msk.mxu0 %vm87_vm6, %v800_v25 }
  0xb2   :  { %v1577_v33 = vmul.f32 %v1575_v32, %v3854_v20  ;;  %v1576_v36 = vmul.f32 %v1574_v4, %v3870_v26 }
  0xb4   :  { %3314 = vmatprep.subr.msk.mxu1 %vm87_vm6, %v1577_v33 }
  0xb6   :  { %3285 = vmatmul.mubr.msk.f32.vlgmr.msra.gmra.mrb[0].mxu0 %vm83_vm9, %v3282_v34  ;;  %3313 = vmatmul.mubr.msk.f32.vlgmr.msra.gmra.mrb[0].mxu1 %vm83_vm9, %v3282_v34 }
  0xb7   :  { %3288 = vmatpush1.msk.msra.mxu0 %vm87_vm6, %v799_v9  ;;  %876 = vmatprep.mubr.f32.mxu0 %v3430_v2 }
  0xb8   :  { %3315 = vmatpush1.msk.msra.mxu1 %vm87_vm6, %v1576_v36  ;;  %1648 = vmatprep.mubr.f32.mxu1 %v3430_v2  ;;  %vm1730_vm6 = vcmask 64512  }
  0xbe   :  { %3289 = vmatmul.mubr.msk.f32.vlgmr.msra.gmra.mrb[0].mxu0 %vm83_vm9, %v3286_v1  ;;  %3316 = vmatmul.mubr.msk.f32.vlgmr.msra.gmra.mrb[0].mxu1 %vm83_vm9, %v3286_v1 }
  0xbf   :  { %1798 = vmatprep.mubr.f32.mxu0 %v3430_v2  ;;  %2553 = vmatprep.mubr.f32.mxu1 %v3430_v2 }
 0x191   :  { %v878_v3 = vpop.f32.mrb[0].mxu0  ;;  %v1650_v37 = vpop.f32.mrb[0].mxu1 }
 0x192   :  { %v880_v0 = vpop.f32.mrb[1].mxu0  ;;  %v1652_v17 = vpop.f32.mrb[1].mxu1  ;;  %v1668_v39 = vmul.f32 %v878_v3, %v878_v3  ;;  %v1674_v41 = vmul.f32 %v1650_v37, %v1650_v37 }
 0x193   :  { %v1660_v42 = vadd.f32 %v880_v0, %v878_v3  ;;  %v1664_v8 = vadd.f32 %v1652_v17, %v1650_v37  ;;  %v1669_v43 = vmul.f32 %v880_v0, %v880_v0  ;;  %v1675_v44 = vmul.f32 %v1652_v17, %v1652_v17 }
 0x195   :  { %1661 = vadd.xlane.f32.xlu0 %v1660_v42  ;;  %1665 = vadd.xlane.f32.xlu1 %v1664_v8  ;;  %v1670_v16 = vadd.f32 %v1669_v43, %v1668_v39  ;;  %v1676_v46 = vadd.f32 %v1675_v44, %v1674_v41  ;;  %v3318_v39 = vld [vmem:[%s4161_s2 + $0x8] sm:$0xff] }
 0x199   :  { %1671 = vadd.xlane.f32.xlu0 %v1670_v16 }
 0x19d   :  { %1677 = vadd.xlane.f32.xlu0 %v1676_v46 }
 0x222   :  { %v1666_v50 = vpop.xlane.xlu1 %1665  ;;  %v1662_v51 = vpop.xlane.xlu0 %1661 }
 0x223   :  { %v1667_v52 = vadd.f32 %v1666_v50, %v1662_v51 }
 0x225   :  { %v1680_v54 = vmul.f32 0.001953125, %v1667_v52 }
 0x226   :  { %v1672_v53 = vpop.xlane.xlu0 %1671 }
 0x227   :  { %v1682_v58 = vmul.f32 %v1680_v54, %v1680_v54 }
 0x22a   :  { %v1678_v56 = vpop.xlane.xlu0 %1677 }
 0x22b   :  { %v1679_v57 = vadd.f32 %v1678_v56, %v1672_v53  ;;  %v1719_v56 = vld [vmem:[%s4161_s2] sm:$0xff] }
 0x22d   :  { %v1681_v59 = vmul.f32 0.001953125, %v1679_v57 }
 0x22f   :  { %v1683_v60 = vsub.f32 %v1681_v59, %v1682_v58 }
 0x231   :  { %v1684_v5 = vadd.f32 1e-05, %v1683_v60 }
 0x233   :  { %3426 = vrsqrt.f32 %v1684_v5 }
 0x23d   :  { %v3427_v11 = vpop.eup %3426 }
 0x23e   :  { %v1686_v12 = vmul.f32 %v3427_v11, %v1657_v10 }
 0x240   :  { %1691 = vperm.xlu1 %3422, %v1686_v12   ;;  %v1687_v14 = vmul.f32 %v1686_v12, %v1680_v54 }
 0x242   :  { %v1688_v15 = vsub.f32 %v3317_v13, %v1687_v14 }
 0x244   :  { %1698 = vperm.xlu0 %3423, %v1688_v15  }
 0x2bf   :  { %v1692_v38 = vpop.permute.xlu1 %1691 }
 0x2c0   :  { %v1694_v21 = vmul.f32 %v1692_v38, %v878_v3  ;;  %v1695_v23 = vmul.f32 %v1692_v38, %v880_v0  ;;  %v1705_v24 = vmul.f32 %v1692_v38, %v1650_v37  ;;  %v1706_v33 = vmul.f32 %v1692_v38, %v1652_v17 }
 0x2c3   :  { %v1699_v22 = vpop.permute.xlu0 %1698 }
 0x2c4   :  { %v1701_v25 = vadd.f32 %v1699_v22, %v1694_v21  ;;  %v1702_v35 = vadd.f32 %v1699_v22, %v1695_v23  ;;  %v1707_v29 = vadd.f32 %v1705_v24, %v1699_v22  ;;  %v1708_v9 = vadd.f32 %v1706_v33, %v1699_v22 }
 0x2c6   :  { %v3907_v28 = vmax.f32 %v1701_v25, 0.0  ;;  %v3913_v4 = vmax.f32 %v1702_v35, 0.0  ;;  %v3915_v32 = vmax.f32 %v1707_v29, 0.0  ;;  %v3925_v34 = vmax.f32 %v1708_v9, 0.0 }
 0x2c8   :  { %1879 = vrot.lane.b32.xlu0 %v3907_v28, %s3433_s20  ;;  %1720 = vrot.lane.b32.xlu1 %v3907_v28, %s3431_s19 }
 0x2cc   :  { %1722 = vrot.lane.b32.xlu1 %v3913_v4, %s3431_s19  ;;  %2631 = vrot.lane.b32.xlu0 %v3915_v32, %s3433_s20 }
 0x2d0   :  { %1965 = vrot.lane.b32.xlu0 %v3907_v28, %s3434_s21  ;;  %2481 = vrot.lane.b32.xlu1 %v3915_v32, %s3431_s19 }
 0x2d4   :  { %2712 = vrot.lane.b32.xlu0 %v3915_v32, %s3434_s21  ;;  %2483 = vrot.lane.b32.xlu1 %v3925_v34, %s3431_s19 }
 0x2d8   :  { %2129 = vrot.lane.b32.xlu0 %v3907_v28, %s3435_s22  ;;  %1711 = vrot.lane.b32.xlu1 %v3907_v28, %s3432_s0 }
 0x2dc   :  { %2866 = vrot.lane.b32.xlu0 %v3915_v32, %s3435_s22  ;;  %1713 = vrot.lane.b32.xlu1 %v3913_v4, %s3432_s0 }
 0x2e0   :  { %2215 = vrot.lane.b32.xlu0 %v3907_v28, %s3436_s23  ;;  %2473 = vrot.lane.b32.xlu1 %v3915_v32, %s3432_s0 }
 0x2e4   :  { %2947 = vrot.lane.b32.xlu0 %v3915_v32, %s3436_s23  ;;  %2475 = vrot.lane.b32.xlu1 %v3925_v34, %s3432_s0 }
 0x2e8   :  { %2301 = vrot.lane.b32.xlu0 %v3907_v28, %s3437_s24  ;;  %1881 = vrot.lane.b32.xlu1 %v3913_v4, %s3433_s20 }
 0x2ec   :  { %3028 = vrot.lane.b32.xlu0 %v3915_v32, %s3437_s24  ;;  %2633 = vrot.lane.b32.xlu1 %v3925_v34, %s3433_s20 }
 0x2f0   :  { %2387 = vrot.lane.b32.xlu0 %v3907_v28, %s3438_s25  ;;  %1967 = vrot.lane.b32.xlu1 %v3913_v4, %s3434_s21 }
 0x2f4   :  { %3109 = vrot.lane.b32.xlu0 %v3915_v32, %s3438_s25  ;;  %2714 = vrot.lane.b32.xlu1 %v3925_v34, %s3434_s21 }
 0x2f8   :  { %2131 = vrot.lane.b32.xlu1 %v3913_v4, %s3435_s22 }
 0x2fc   :  { %2868 = vrot.lane.b32.xlu1 %v3925_v34, %s3435_s22 }
 0x300   :  { %2217 = vrot.lane.b32.xlu1 %v3913_v4, %s3436_s23 }
 0x304   :  { %2949 = vrot.lane.b32.xlu1 %v3925_v34, %s3436_s23 }
 0x308   :  { %2303 = vrot.lane.b32.xlu1 %v3913_v4, %s3437_s24 }
 0x30c   :  { %3030 = vrot.lane.b32.xlu1 %v3925_v34, %s3437_s24 }
 0x310   :  { %2389 = vrot.lane.b32.xlu1 %v3913_v4, %s3438_s25 }
 0x314   :  { %3111 = vrot.lane.b32.xlu1 %v3925_v34, %s3438_s25 }
 0x33a   :  { %v1721_v36 = vpop.permute.xlu1 %1720  ;;  %v1880_v42 = vpop.permute.xlu0 %1879 }
 0x33e   :  { %v1723_v1 = vpop.permute.xlu1 %1722  ;;  %v2632_v49 = vpop.permute.xlu0 %2631 }
 0x33f   :  { %v1724_v3 = vsel %vm76_vm4, %v1721_v36, %v1723_v1  ;;  %v1725_v37 = vsel %vm76_vm4, %v1723_v1, %v1721_v36 }
 0x340   :  { %v1726_v0 = vmul.f32 %v1725_v37, %v3582_v18  ;;  %v1727_v17 = vmul.f32 %v1724_v3, %v3587_v19 }
 0x342   :  { %1734 = vmatprep.subr.mxu0 %v1727_v17  ;;  %v2482_v41 = vpop.permute.xlu1 %2481  ;;  %v1966_v54 = vpop.permute.xlu0 %1965 }
 0x343   :  { %1735 = vmatpush1.msra.mxu0 %v1726_v0 }
 0x344   :  { %3319 = vmatmul.mubr.msk.f32.vlgmr.msra.gmra.mrb[2].mxu0 %vm1730_vm6, %v3318_v39 }
 0x345   :  { %1872 = vmatprep.mubr.f32.mxu0 %v3430_v2 }
 0x346   :  { %v2484_v8 = vpop.permute.xlu1 %2483  ;;  %v2713_v58 = vpop.permute.xlu0 %2712 }
 0x347   :  { %v2485_v43 = vsel %vm76_vm4, %v2482_v41, %v2484_v8  ;;  %v2486_v44 = vsel %vm76_vm4, %v2484_v8, %v2482_v41 }
 0x348   :  { %v2487_v16 = vmul.f32 %v2486_v44, %v3582_v18  ;;  %v2488_v46 = vmul.f32 %v2485_v43, %v3587_v19 }
 0x34a   :  { %2489 = vmatprep.subr.mxu1 %v2488_v46  ;;  %v1712_v50 = vpop.permute.xlu1 %1711  ;;  %v2130_v15 = vpop.permute.xlu0 %2129 }
 0x34b   :  { %2490 = vmatpush1.msra.mxu1 %v2487_v16 }
 0x34c   :  { %3335 = vmatmul.mubr.msk.f32.vlgmr.msra.gmra.mrb[2].mxu1 %vm1730_vm6, %v3318_v39 }
 0x34d   :  { %2624 = vmatprep.mubr.f32.mxu1 %v3430_v2 }
 0x34e   :  { %v1714_v51 = vpop.permute.xlu1 %1713  ;;  %v2867_v35 = vpop.permute.xlu0 %2866 }
 0x34f   :  { %v1715_v52 = vsel %vm66_vm8, %v1712_v50, %v1714_v51  ;;  %v1716_v53 = vsel %vm66_vm8, %v1714_v51, %v1712_v50 }
 0x350   :  { %v1717_v18 = vmul.f32 %v1716_v53, %v3611_v30  ;;  %v1718_v19 = vmul.f32 %v1715_v52, %v3614_v31 }
 0x352   :  { %1808 = vmatprep.subr.mxu0 %v1718_v19  ;;  %v2474_v57 = vpop.permute.xlu1 %2473  ;;  %v2216_v0 = vpop.permute.xlu0 %2215 }
 0x353   :  { %1809 = vmatpush1.msra.mxu0 %v1717_v18 }
 0x354   :  { %3320 = vmatmul.mubr.msk.f32.vlgmr.msra.gmra.mrb[2].mxu0 %vm1730_vm6, %v1719_v56 }
 0x355   :  { %1956 = vmatprep.mubr.f32.mxu0 %v3430_v2 }
 0x356   :  { %v2476_v59 = vpop.permute.xlu1 %2475 }
 0x357   :  { %v2477_v60 = vsel %vm66_vm8, %v2474_v57, %v2476_v59  ;;  %v2478_v5 = vsel %vm66_vm8, %v2476_v59, %v2474_v57 }
 0x358   :  { %v2479_v10 = vmul.f32 %v2478_v5, %v3611_v30  ;;  %v2480_v11 = vmul.f32 %v2477_v60, %v3614_v31  ;;  %v3321_v30 = vld [vmem:[%s4161_s2 + $0x10] sm:$0xff] }
 0x35a   :  { %2560 = vmatprep.subr.mxu1 %v2480_v11  ;;  %v1882_v12 = vpop.permute.xlu1 %1881 }
 0x35b   :  { %v1883_v13 = vsel %vm249_vm14, %v1880_v42, %v1882_v12  ;;  %v1884_v14 = vsel %vm249_vm14, %v1882_v12, %v1880_v42  ;;  %2561 = vmatpush1.msra.mxu1 %v2479_v10 }
 0x35c   :  { %v1885_v38 = vmul.f32 %v1884_v14, %v3659_v47  ;;  %v1886_v21 = vmul.f32 %v1883_v13, %v3662_v48  ;;  %3336 = vmatmul.mubr.msk.f32.vlgmr.msra.gmra.mrb[2].mxu1 %vm1730_vm6, %v1719_v56 }
 0x35d   :  { %2703 = vmatprep.mubr.f32.mxu1 %v3430_v2 }
 0x35e   :  { %1892 = vmatprep.subr.mxu0 %v1886_v21  ;;  %v2634_v31 = vpop.permute.xlu1 %2633 }
 0x35f   :  { %v2635_v22 = vsel %vm249_vm14, %v2632_v49, %v2634_v31  ;;  %v2636_v23 = vsel %vm249_vm14, %v2634_v31, %v2632_v49  ;;  %1893 = vmatpush1.msra.mxu0 %v1885_v38 }
 0x360   :  { %v2637_v24 = vmul.f32 %v2636_v23, %v3659_v47  ;;  %v2638_v25 = vmul.f32 %v2635_v22, %v3662_v48  ;;  %3322 = vmatmul.mubr.msk.f32.vlgmr.msra.gmra.mrb[2].mxu0 %vm1730_vm6, %v3321_v30  ;;  %v3323_v48 = vld [vmem:[%s4161_s2 + $0x18] sm:$0xff] }
 0x361   :  { %2042 = vmatprep.mubr.f32.mxu0 %v3430_v2 }
 0x362   :  { %2639 = vmatprep.subr.mxu1 %v2638_v25  ;;  %v1968_v29 = vpop.permute.xlu1 %1967 }
 0x363   :  { %v1969_v33 = vsel %vm342_vm15, %v1966_v54, %v1968_v29  ;;  %v1970_v9 = vsel %vm342_vm15, %v1968_v29, %v1966_v54  ;;  %2640 = vmatpush1.msra.mxu1 %v2637_v24 }
 0x364   :  { %v1971_v36 = vmul.f32 %v1970_v9, %v3691_v62  ;;  %v1972_v47 = vmul.f32 %v1969_v33, %v3696_v63  ;;  %3337 = vmatmul.mubr.msk.f32.vlgmr.msra.gmra.mrb[2].mxu1 %vm1730_vm6, %v3321_v30  ;;  %v3333_v33 = vld [vmem:[%s4161_s2 + $0x40] sm:$0xff] }
 0x365   :  { %2784 = vmatprep.mubr.f32.mxu1 %v3430_v2 }
 0x366   :  { %1978 = vmatprep.subr.mxu0 %v1972_v47  ;;  %v2715_v1 = vpop.permute.xlu1 %2714 }
 0x367   :  { %v2716_v3 = vsel %vm342_vm15, %v2713_v58, %v2715_v1  ;;  %v2717_v37 = vsel %vm342_vm15, %v2715_v1, %v2713_v58  ;;  %1979 = vmatpush1.msra.mxu0 %v1971_v36 }
 0x368   :  { %v2718_v17 = vmul.f32 %v2717_v37, %v3691_v62  ;;  %v2719_v39 = vmul.f32 %v2716_v3, %v3696_v63  ;;  %3324 = vmatmul.mubr.msk.f32.vlgmr.msra.gmra.mrb[2].mxu0 %vm1730_vm6, %v3323_v48  ;;  %2056 = vmatprep.subr.mxu0 %v3913_v4  ;;  %v3325_v63 = vld [vmem:[%s4161_s2 + $0x20] sm:$0xff] }
 0x369   :  { %2057 = vmatpush1.msra.mxu0 %v3907_v28  ;;  %2120 = vmatprep.mubr.f32.mxu0 %v3430_v2  ;;  %v2948_v28 = vpop.permute.xlu0 %2947 }
 0x36a   :  { %2720 = vmatprep.subr.mxu1 %v2719_v39  ;;  %v2132_v41 = vpop.permute.xlu1 %2131 }
 0x36b   :  { %v2134_v42 = vsel %vm517_vm0, %v2132_v41, %v2130_v15  ;;  %2721 = vmatpush1.msra.mxu1 %v2718_v17  ;;  %v2133_v8 = vsel %vm517_vm0, %v2130_v15, %v2132_v41 }
 0x36c   :  { %v2136_v62 = vmul.f32 %v2134_v42, %v3730_v27  ;;  %3338 = vmatmul.mubr.msk.f32.vlgmr.msra.gmra.mrb[2].mxu1 %vm1730_vm6, %v3323_v48  ;;  %2793 = vmatprep.subr.mxu1 %v3925_v34  ;;  %v2135_v43 = vmul.f32 %v2133_v8, %v3752_v7 }
 0x36d   :  { %2794 = vmatpush1.msra.mxu1 %v3915_v32  ;;  %2857 = vmatprep.mubr.f32.mxu1 %v3430_v2  ;;  %v2302_v50 = vpop.permute.xlu0 %2301 }
 0x36e   :  { %2142 = vmatprep.subr.mxu0 %v2136_v62  ;;  %v2869_v4 = vpop.permute.xlu1 %2868 }
 0x36f   :  { %v2871_v44 = vsel %vm517_vm0, %v2869_v4, %v2867_v35  ;;  %v2870_v16 = vsel %vm517_vm0, %v2867_v35, %v2869_v4 }
 0x370   :  { %v2873_v34 = vmul.f32 %v2871_v44, %v3730_v27  ;;  %3326 = vmatmul.mubr.msk.f32.vlgmr.msra.gmra.mrb[2].mxu0 %vm1730_vm6, %v3325_v63  ;;  %v2872_v46 = vmul.f32 %v2870_v16, %v3752_v7  ;;  %v3327_v27 = vld [vmem:[%s4161_s2 + $0x28] sm:$0xff]  ;;  %v3344_v16 = vld [vmem:[%s4160_s3 + $0x10] sm:$0xff] }
 0x371   :  { %2143 = vmatpush1.msra.mxu0 %v2135_v43  ;;  %2206 = vmatprep.mubr.f32.mxu0 %v3430_v2  ;;  %v3029_v56 = vpop.permute.xlu0 %3028 }
 0x372   :  { %2874 = vmatprep.subr.mxu1 %v2873_v34  ;;  %v2218_v32 = vpop.permute.xlu1 %2217 }
 0x373   :  { %v2220_v49 = vsel %vm610_vm3, %v2218_v32, %v2216_v0  ;;  %v2219_v51 = vsel %vm610_vm3, %v2216_v0, %v2218_v32 }
 0x374   :  { %v2222_v52 = vmul.f32 %v2220_v49, %v3782_v40  ;;  %3339 = vmatmul.mubr.msk.f32.vlgmr.msra.gmra.mrb[2].mxu1 %vm1730_vm6, %v3325_v63  ;;  %v2221_v53 = vmul.f32 %v2219_v51, %v3798_v45 }
 0x375   :  { %2875 = vmatpush1.msra.mxu1 %v2872_v46  ;;  %2938 = vmatprep.mubr.f32.mxu1 %v3430_v2  ;;  %v2388_v12 = vpop.permute.xlu0 %2387  ;;  %v3345_v46 = vld [vmem:[%s4160_s3 + $0x18] sm:$0xff] }
 0x376   :  { %2228 = vmatprep.subr.mxu0 %v2222_v52  ;;  %v2950_v7 = vpop.permute.xlu1 %2949 }
 0x377   :  { %v2952_v54 = vsel %vm610_vm3, %v2950_v7, %v2948_v28  ;;  %v2951_v18 = vsel %vm610_vm3, %v2948_v28, %v2950_v7 }
 0x378   :  { %v2954_v19 = vmul.f32 %v2952_v54, %v3782_v40  ;;  %3328 = vmatmul.mubr.msk.f32.vlgmr.msra.gmra.mrb[2].mxu0 %vm1730_vm6, %v3327_v27  ;;  %v2953_v58 = vmul.f32 %v2951_v18, %v3798_v45  ;;  %v3329_v40 = vld [vmem:[%s4161_s2 + $0x30] sm:$0xff] }
 0x379   :  { %2229 = vmatpush1.msra.mxu0 %v2221_v53  ;;  %2292 = vmatprep.mubr.f32.mxu0 %v3430_v2  ;;  %v3110_v22 = vpop.permute.xlu0 %3109 }
 0x37a   :  { %2955 = vmatprep.subr.mxu1 %v2954_v19  ;;  %v2304_v57 = vpop.permute.xlu1 %2303 }
 0x37b   :  { %v2306_v59 = vsel %vm703_vm2, %v2304_v57, %v2302_v50  ;;  %v2305_v60 = vsel %vm703_vm2, %v2302_v50, %v2304_v57 }
 0x37c   :  { %v2308_v5 = vmul.f32 %v2306_v59, %v3818_v55  ;;  %3340 = vmatmul.mubr.msk.f32.vlgmr.msra.gmra.mrb[2].mxu1 %vm1730_vm6, %v3327_v27  ;;  %v2307_v45 = vmul.f32 %v2305_v60, %v3832_v61 }
 0x37d   :  { %2956 = vmatpush1.msra.mxu1 %v2953_v58  ;;  %3019 = vmatprep.mubr.f32.mxu1 %v3430_v2 }
 0x37e   :  { %2314 = vmatprep.subr.mxu0 %v2308_v5  ;;  %v3031_v10 = vpop.permute.xlu1 %3030 }
 0x37f   :  { %v3033_v11 = vsel %vm703_vm2, %v3031_v10, %v3029_v56  ;;  %v3032_v13 = vsel %vm703_vm2, %v3029_v56, %v3031_v10 }
 0x380   :  { %v3035_v14 = vmul.f32 %v3033_v11, %v3818_v55  ;;  %3330 = vmatmul.mubr.msk.f32.vlgmr.msra.gmra.mrb[2].mxu0 %vm1730_vm6, %v3329_v40  ;;  %v3034_v38 = vmul.f32 %v3032_v13, %v3832_v61  ;;  %v3331_v55 = vld [vmem:[%s4161_s2 + $0x38] sm:$0xff] }
 0x381   :  { %2315 = vmatpush1.msra.mxu0 %v2307_v45  ;;  %2378 = vmatprep.mubr.f32.mxu0 %v3430_v2 }
 0x382   :  { %3036 = vmatprep.subr.mxu1 %v3035_v14  ;;  %v2390_v15 = vpop.permute.xlu1 %2389 }
 0x383   :  { %v2392_v21 = vsel %vm796_vm5, %v2390_v15, %v2388_v12  ;;  %v2391_v30 = vsel %vm796_vm5, %v2388_v12, %v2390_v15 }
 0x384   :  { %v2394_v31 = vmul.f32 %v2392_v21, %v3854_v20  ;;  %3341 = vmatmul.mubr.msk.f32.vlgmr.msra.gmra.mrb[2].mxu1 %vm1730_vm6, %v3329_v40  ;;  %v2393_v23 = vmul.f32 %v2391_v30, %v3870_v26 }
 0x385   :  { %3037 = vmatpush1.msra.mxu1 %v3034_v38  ;;  %3100 = vmatprep.mubr.f32.mxu1 %v3430_v2 }
 0x386   :  { %2400 = vmatprep.subr.mxu0 %v2394_v31  ;;  %v3112_v61 = vpop.permute.xlu1 %3111 }
 0x387   :  { %v3114_v24 = vsel %vm796_vm5, %v3112_v61, %v3110_v22  ;;  %v3113_v25 = vsel %vm796_vm5, %v3110_v22, %v3112_v61 }
 0x388   :  { %v3116_v35 = vmul.f32 %v3114_v24, %v3854_v20  ;;  %3332 = vmatmul.mubr.msk.f32.vlgmr.msra.gmra.mrb[2].mxu0 %vm1730_vm6, %v3331_v55  ;;  %v3115_v29 = vmul.f32 %v3113_v25, %v3870_v26 }
 0x389   :  { %2401 = vmatpush1.msra.mxu0 %v2393_v23  ;;  %2464 = vmatprep.mubr.f32.mxu0 %v3430_v2 }
 0x38a   :  { %3117 = vmatprep.subr.mxu1 %v3116_v35 }
 0x38c   :  { %3342 = vmatmul.mubr.msk.f32.vlgmr.msra.gmra.mrb[2].mxu1 %vm1730_vm6, %v3331_v55 }
 0x38d   :  { %3118 = vmatpush1.msra.mxu1 %v3115_v29  ;;  %3181 = vmatprep.mubr.f32.mxu1 %v3430_v2 }
 0x390   :  { %3334 = vmatmul.mubr.msk.f32.vlgmr.msra.gmra.mrb[2].mxu0 %vm1730_vm6, %v3333_v33 }
 0x394   :  { %3343 = vmatmul.mubr.msk.f32.vlgmr.msra.gmra.mrb[2].mxu1 %vm1730_vm6, %v3333_v33 }
 0x463   :  { %v2466_v6 = vpop.f32.mrb[2].mxu0 }
 0x464   :  { %v2468_v20 = vpop.f32.mrb[3].mxu0  ;;  %v3202_v9 = vmul.f32 %v2466_v6, %v2466_v6 }
 0x465   :  { %v3203_v36 = vmul.f32 %v2468_v20, %v2468_v20  ;;  %v3194_v47 = vadd.f32 %v2468_v20, %v2466_v6 }
 0x467   :  { %3195 = vadd.xlane.f32.xlu0 %v3194_v47  ;;  %v3183_v26 = vpop.f32.mrb[2].mxu1  ;;  %v3204_v48 = vadd.f32 %v3203_v36, %v3202_v9 }
 0x468   :  { %v3185_v1 = vpop.f32.mrb[3].mxu1  ;;  %v3208_v3 = vmul.f32 %v3183_v26, %v3183_v26 }
 0x469   :  { %v3209_v37 = vmul.f32 %v3185_v1, %v3185_v1  ;;  %v3198_v0 = vadd.f32 %v3185_v1, %v3183_v26 }
 0x46b   :  { %3205 = vadd.xlane.f32.xlu0 %v3204_v48  ;;  %3199 = vadd.xlane.f32.xlu1 %v3198_v0  ;;  %v3210_v17 = vadd.f32 %v3209_v37, %v3208_v3 }
 0x46f   :  { %3211 = vadd.xlane.f32.xlu0 %v3210_v17 }
 0x4f4   :  { %v3196_v2 = vpop.xlane.xlu0 %3195 }
 0x4f8   :  { %v3206_v39 = vpop.xlane.xlu0 %3205  ;;  %v3200_v41 = vpop.xlane.xlu1 %3199 }
 0x4f9   :  { %v3201_v42 = vadd.f32 %v3200_v41, %v3196_v2 }
 0x4fb   :  { %v3214_v8 = vmul.f32 0.001953125, %v3201_v42 }
 0x4fc   :  { %v3212_v62 = vpop.xlane.xlu0 %3211 }
 0x4fd   :  { %v3213_v63 = vadd.f32 %v3212_v62, %v3206_v39  ;;  %v3216_v28 = vmul.f32 %v3214_v8, %v3214_v8 }
 0x4ff   :  { %v3215_v4 = vmul.f32 0.001953125, %v3213_v63 }
 0x501   :  { %v3217_v43 = vsub.f32 %v3215_v4, %v3216_v28 }
 0x503   :  { %v3218_v44 = vadd.f32 1e-05, %v3217_v43 }
 0x505   :  { %3428 = vrsqrt.f32 %v3218_v44 }
 0x50f   :  { %v3429_v34 = vpop.eup %3428 }
 0x510   :  { %v3220_v32 = vmul.f32 %v3429_v34, %v3344_v16 }
 0x512   :  { %3225 = vperm.xlu1 %3422, %v3220_v32   ;;  %v3221_v49 = vmul.f32 %v3220_v32, %v3214_v8 }
 0x514   :  { %v3222_v50 = vsub.f32 %v3345_v46, %v3221_v49 }
 0x516   :  { %3232 = vperm.xlu0 %3423, %v3222_v50  }
 0x591   :  { %v3226_v51 = vpop.permute.xlu1 %3225 }
 0x592   :  { %v3228_v52 = vmul.f32 %v3226_v51, %v2466_v6  ;;  %v3229_v27 = vmul.f32 %v3226_v51, %v2468_v20  ;;  %v3239_v7 = vmul.f32 %v3226_v51, %v3183_v26  ;;  %v3240_v53 = vmul.f32 %v3226_v51, %v3185_v1 }
 0x595   :  { %v3233_v54 = vpop.permute.xlu0 %3232 }
 0x596   :  { %v3235_v18 = vadd.f32 %v3233_v54, %v3228_v52  ;;  %v3236_v19 = vadd.f32 %v3233_v54, %v3229_v27  ;;  %v3241_v56 = vadd.f32 %v3239_v7, %v3233_v54  ;;  %v3242_v57 = vadd.f32 %v3240_v53, %v3233_v54 }
 0x598   :  { %v3237_v58 = vmax.f32 %v3235_v18, 0.0  ;;  %v3238_v59 = vmax.f32 %v3236_v19, 0.0  ;;  %v3243_v60 = vmax.f32 %v3241_v56, 0.0  ;;  %v3244_v5 = vmax.f32 %v3242_v57, 0.0 }
 0x59a   :  { %3245 = vst [vmem:[%s4162_s4] sm:$0xff] %v3237_v58  ;;  %3246 = vst [vmem:[%s4162_s4 + $0x8] sm:$0xff] %v3238_v59 }
 0x59b   :  { %3346 = vst [vmem:[%s4162_s4 + $0x10] sm:$0xff] %v3243_v60  ;;  %3347 = vst [vmem:[%s4162_s4 + $0x18] sm:$0xff] %v3244_v5 }

</bundles_post_ra>
